<compile_context>
chip_gen: v7x
topology: tpu7x:2x2x1
jax: 0.10.0
libtpu: 0.0.40
codegen_flags: <defaults>
</compile_context>

<pallas_src>
import functools

import jax
import jax.numpy as jnp
from jax import lax
from jax.experimental import pallas as pl
from jax.experimental.pallas import tpu as pltpu


def _round_up(x: int, m: int) -> int:
    return ((x + m - 1) // m) * m


# ----------------------------------------------------------------------------
# Kernel 1: M-tiled matmul + bias + ReLU (all conv im2col matmuls)
#   x:(TILE_M, K) bf16, w:(K, Npad) bf16 (pre-transposed, lane-padded to 128),
#   b:(1, Npad) f32  ->  o:(TILE_M, Npad) f32
# ----------------------------------------------------------------------------
def _matmul_bias_relu_kernel(x_ref, w_ref, b_ref, o_ref):
    acc = jnp.dot(x_ref[...], w_ref[...], preferred_element_type=jnp.float32)
    o_ref[...] = jnp.maximum(acc + b_ref[...], 0.0)


def pallas_matmul_bias_relu(x, w_t, b, *, max_tile_m: int = 512):
    m, k = x.shape
    n = w_t.shape[1]
    tile_m = min(max_tile_m, _round_up(m, 8))
    grid_m = pl.cdiv(m, tile_m)

    # Explicit scoped-VMEM budget: 2x double-buffered in/out tiles (+ margin),
    # clamped to stay safely inside v7x's 64 MiB physical VMEM.
    bytes_in = 2 * (tile_m * k * x.dtype.itemsize + k * n * w_t.dtype.itemsize + n * 4)
    bytes_out = 2 * tile_m * n * 4
    vmem_limit = int(min(48 * 1024 * 1024,
                         max(16 * 1024 * 1024, 2 * (bytes_in + bytes_out))))

    cost = pl.CostEstimate(
        flops=2 * m * k * n,
        transcendentals=0,
        bytes_accessed=m * k * x.dtype.itemsize
        + k * n * w_t.dtype.itemsize + m * n * 4)

    return pl.pallas_call(
        _matmul_bias_relu_kernel,
        grid=(grid_m,),
        in_specs=[
            pl.BlockSpec((tile_m, k), lambda i: (i, 0)),
            pl.BlockSpec((k, n), lambda i: (0, 0)),
            pl.BlockSpec((1, n), lambda i: (0, 0)),
        ],
        out_specs=pl.BlockSpec((tile_m, n), lambda i: (i, 0)),
        out_shape=jax.ShapeDtypeStruct((m, n), jnp.float32),
        compiler_params=pltpu.CompilerParams(
            dimension_semantics=("parallel",),
            vmem_limit_bytes=vmem_limit),
        cost_estimate=cost,
    )(x, w_t, b)


# ----------------------------------------------------------------------------
# Kernel 2: fused fc + hypermodel + all-z Q heads (single pallas_call)
# ----------------------------------------------------------------------------
def _fused_head_kernel(cf_ref, fcw_ref, fcb_ref, gp_ref, hbw_ref, zx_ref,
                       hwb_ref, hbb_ref, o_ref):
    # feature = relu(conv_flat @ fc_w_t + fc_b)                    (B, 512) f32
    feat = jnp.dot(cf_ref[...], fcw_ref[...], preferred_element_type=jnp.float32)
    feat = jnp.maximum(feat + fcb_ref[...], 0.0)
    # head weights for ALL z, already in (512, Nz*A) layout (no transpose):
    whead = jnp.dot(gp_ref[...], zx_ref[...], preferred_element_type=jnp.float32)
    whead = whead + hbw_ref[...]
    # bias_coef-scaled head biases, (1, Nz*A):
    brow = jnp.dot(hwb_ref[...], zx_ref[...], preferred_element_type=jnp.float32)
    brow = brow + hbb_ref[...]
    # all heads in one MXU matmul, lane-dense (B, Nz*A) output:
    o_ref[...] = jnp.dot(feat, whead, preferred_element_type=jnp.float32) + brow


def pallas_fused_fc_hyper_head(conv_flat, fc_w_t, fc_b, gp2, hbw, zexp,
                               hwb_s, hbb):
    bsz = conv_flat.shape[0]
    nza = hbw.shape[1]
    return pl.pallas_call(
        _fused_head_kernel,
        out_shape=jax.ShapeDtypeStruct((bsz, nza), jnp.float32),
    )(conv_flat, fc_w_t, fc_b, gp2, hbw, zexp, hwb_s, hbb)


# ----------------------------------------------------------------------------
# Conv = im2col (wrapper glue, bf16) + Pallas matmul kernel
# ----------------------------------------------------------------------------
def conv2d_relu(x, w, b, ksize: int, stride: int):
    """VALID conv, NCHW in / NCHW out, fused bias+ReLU; matmul runs in Pallas."""
    bsz, c, h, ww = x.shape
    out_c = w.shape[0]
    ho = (h - ksize) // stride + 1
    wo = (ww - ksize) // stride + 1

    xb = x.astype(jnp.bfloat16)
    cols = []
    for i in range(ksize):
        for j in range(ksize):
            cols.append(xb[:, :, i:i + stride * ho:stride, j:j + stride * wo:stride])
    # (B, C, k*k, Ho, Wo) -> (B*Ho*Wo, C*k*k); matches PyTorch weight flatten.
    patches = jnp.stack(cols, axis=2)
    patches = patches.transpose(0, 3, 4, 1, 2).reshape(bsz * ho * wo, c * ksize * ksize)

    k_dim = c * ksize * ksize
    n_pad = _round_up(out_c, 128)
    w_t = w.reshape(out_c, k_dim).T.astype(jnp.bfloat16)        # (K, out_c)
    w_t = jnp.pad(w_t, ((0, 0), (0, n_pad - out_c)))            # lane-pad to 128
    b2 = jnp.pad(b.astype(jnp.float32).reshape(1, out_c),
                 ((0, 0), (0, n_pad - out_c)))

    out = pallas_matmul_bias_relu(patches, w_t, b2)             # (B*Ho*Wo, n_pad)
    out = out[:, :out_c]
    return out.reshape(bsz, ho, wo, out_c).transpose(0, 3, 1, 2)  # NCHW, f32


# ----------------------------------------------------------------------------
# Parameter construction (deterministic, synthetic)
# ----------------------------------------------------------------------------
def init_params(key, c, h, w, num_action, z_size):
    def conv_out(sz, k, s):
        return (sz - k) // s + 1

    h1, w1 = conv_out(h, 8, 4), conv_out(w, 8, 4)
    h2, w2 = conv_out(h1, 4, 2), conv_out(w1, 4, 2)
    h3, w3 = conv_out(h2, 3, 1), conv_out(w2, 3, 1)
    cnn_output_dim = 64 * h3 * w3
    output_dim = num_action * (512 + 1)

    keys = jax.random.split(key, 10)
    sc = 0.05
    params = {
        "conv1_w": sc * jax.random.normal(keys[0], (32, c, 8, 8), jnp.float32),
        "conv1_b": sc * jax.random.normal(keys[1], (32,), jnp.float32),
        "conv2_w": sc * jax.random.normal(keys[2], (64, 32, 4, 4), jnp.float32),
        "conv2_b": sc * jax.random.normal(keys[3], (64,), jnp.float32),
        "conv3_w": sc * jax.random.normal(keys[4], (64, 64, 3, 3), jnp.float32),
        "conv3_b": sc * jax.random.normal(keys[5], (64,), jnp.float32),
        "fc_w": sc * jax.random.normal(keys[6], (512, cnn_output_dim), jnp.float32),
        "fc_b": sc * jax.random.normal(keys[7], (512,), jnp.float32),
        "hyper_w": sc * jax.random.normal(keys[8], (output_dim, z_size), jnp.float32),
        "hyper_b": sc * jax.random.normal(keys[9], (output_dim,), jnp.float32),
    }
    return params, cnn_output_dim


# ----------------------------------------------------------------------------
# Full forward pass (mirrors HyperDQNWithoutPrior.forward)
# ----------------------------------------------------------------------------
def hyper_dqn_forward(params, x, z, num_action: int, bias_coef: float = 0.01):
    x = x.astype(jnp.float32)
    z = z.astype(jnp.float32)

    h = conv2d_relu(x, params["conv1_w"], params["conv1_b"], 8, 4)
    h = conv2d_relu(h, params["conv2_w"], params["conv2_b"], 4, 2)
    h = conv2d_relu(h, params["conv3_w"], params["conv3_b"], 3, 1)

    bsz = h.shape[0]
    conv_flat = h.reshape(bsz, -1).astype(jnp.bfloat16)          # Flatten (NCHW)
    fc_w_t = params["fc_w"].T.astype(jnp.bfloat16)               # (cnn_dim, 512)
    fc_b = params["fc_b"].astype(jnp.float32).reshape(1, -1)     # (1, 512)

    # --- one-time layout plumbing for the fused hyper/head kernel -----------
    a = num_action
    d_hid = 512
    nz, z_size = z.shape
    wh = params["hyper_w"]                                       # (A*(512+1), z)
    bh = params["hyper_b"]

    # Gp[d, s*A + a'] = wh[a'*512 + d, s]      (weight part, permuted)
    gp2 = jnp.transpose(wh[:a * d_hid].reshape(a, d_hid, z_size),
                        (1, 2, 0)).reshape(d_hid, z_size * a).astype(jnp.float32)
    # Hbw[d, k*A + a'] = bh[a'*512 + d]        (k-independent, tiled over z)
    hbw = jnp.tile(bh[:a * d_hid].reshape(a, d_hid).T, (1, nz)).astype(jnp.float32)
    # Zexp[s*A + a, k*A + a'] = z[k, s] * delta(a, a')
    zexp = jnp.kron(z.T, jnp.eye(a, dtype=jnp.float32))          # (z*A, Nz*A)
    # bias_coef folded in once (wrapper-side), per the review:
    hwb_s = (bias_coef * wh[a * d_hid:]).T.reshape(1, z_size * a).astype(jnp.float32)
    hbb = jnp.tile((bias_coef * bh[a * d_hid:]).reshape(1, a),
                   (1, nz)).astype(jnp.float32)

    q_flat = pallas_fused_fc_hyper_head(conv_flat, fc_w_t, fc_b,
                                        gp2, hbw, zexp, hwb_s, hbb)  # (B, Nz*A)
    q = q_flat.reshape(bsz, nz, a)
    if nz == 1:
        q = q[:, 0, :]
    return q, None


# ----------------------------------------------------------------------------
# Pure-JAX reference (same bf16 casting points; correctness check only)
# ----------------------------------------------------------------------------
def reference_forward(params, x, z, num_action: int, bias_coef: float = 0.01):
    dn = ("NCHW", "OIHW", "NCHW")
    cd = jnp.bfloat16

    def conv(h, w, b, s):
        out = lax.conv_general_dilated(h.astype(cd), w.astype(cd), (s, s), "VALID",
                                       dimension_numbers=dn,
                                       preferred_element_type=jnp.float32)
        return jax.nn.relu(out + b[None, :, None, None])

    h = conv(x, params["conv1_w"], params["conv1_b"], 4)
    h = conv(h, params["conv2_w"], params["conv2_b"], 2)
    h = conv(h, params["conv3_w"], params["conv3_b"], 1)
    feat_in = h.reshape(h.shape[0], -1)
    feat = jax.nn.relu(
        jnp.dot(feat_in.astype(cd), params["fc_w"].T.astype(cd),
                preferred_element_type=jnp.float32) + params["fc_b"])
    hyper_out = z @ params["hyper_w"].T + params["hyper_b"]
    nz = z.shape[0]
    w_heads = hyper_out[:, :num_action * 512].reshape(nz, num_action, 512)
    b_heads = hyper_out[:, num_action * 512:] * bias_coef
    q = jnp.einsum("bd,kad->bka", feat, w_heads) + b_heads[None, :, :]
    if nz == 1:
        q = q[:, 0, :]
    return q


if __name__ == "__main__":
    # Small shapes consistent with the module (Atari-style conv stack).
    B, C, H, W = 2, 4, 44, 44        # 44 -> 10 -> 4 -> 2  => cnn_output_dim = 256
    NUM_ACTION = 6
    Z_SIZE = 8
    NZ = 3
    BIAS_COEF = 0.01

    key = jax.random.PRNGKey(0)
    k_param, k_x, k_z = jax.random.split(key, 3)
    params, cnn_dim = init_params(k_param, C, H, W, NUM_ACTION, Z_SIZE)

    x = jax.random.uniform(k_x, (B, C, H, W), jnp.float32)
    z = jax.random.normal(k_z, (NZ, Z_SIZE), jnp.float32)

    fwd = jax.jit(functools.partial(hyper_dqn_forward,
                                    num_action=NUM_ACTION, bias_coef=BIAS_COEF))
    q, state = fwd(params, x, z)
    q = jax.block_until_ready(q)
    assert q.shape == (B, NZ, NUM_ACTION), q.shape

    q_ref = jax.block_until_ready(
        reference_forward(params, x, z, NUM_ACTION, BIAS_COEF))
    max_err = float(jnp.max(jnp.abs(q - q_ref)))
    assert jnp.allclose(q, q_ref, rtol=2e-3, atol=2e-3), max_err

    print("KERNEL_OK")
</pallas_src>

<mosaic_0001>
module attributes {stable_mosaic.version = 11 : i64} {
  func.func @_matmul_bias_relu_kernel(%arg0: i32, %arg1: memref<200x256xbf16, #tpu.memory_space<vmem>>, %arg2: memref<256x128xbf16, #tpu.memory_space<vmem>>, %arg3: memref<1x128xf32, #tpu.memory_space<vmem>>, %arg4: memref<200x128xf32, #tpu.memory_space<vmem>>) attributes {dimension_semantics = [#tpu.dimension_semantics<parallel>], iteration_bounds = array<i64: 1>, scalar_prefetch = 0 : i64, scratch_operands = 0 : i64, tpu.core_type = #tpu.core_type<tc>, window_params = [{transform_indices = @transform_0, window_bounds = array<i64: 200, 256>}, {pipeline_mode = #tpu.pipeline_mode<synchronous>, transform_indices = @transform_1, window_bounds = array<i64: 256, 128>}, {pipeline_mode = #tpu.pipeline_mode<synchronous>, transform_indices = @transform_2, window_bounds = array<i64: 1, 128>}, {transform_indices = @transform_3, window_bounds = array<i64: 200, 128>}]} {
    %c0 = arith.constant 0 : index
    %c0_0 = arith.constant 0 : index
    %0 = vector.load %arg1[%c0, %c0_0] : memref<200x256xbf16, #tpu.memory_space<vmem>>, vector<200x256xbf16>
    %c0_1 = arith.constant 0 : index
    %c0_2 = arith.constant 0 : index
    %1 = vector.load %arg2[%c0_1, %c0_2] : memref<256x128xbf16, #tpu.memory_space<vmem>>, vector<256x128xbf16>
    %cst = arith.constant dense<0.000000e+00> : vector<200x128xf32>
    %2 = tpu.matmul %0, %1, %cst {dimension_numbers = #tpu.dot_dimension_numbers<[1], [0], [0], [1], [0, 0, 1, 1], [], []>} : vector<200x256xbf16>, vector<256x128xbf16>, vector<200x128xf32> -> vector<200x128xf32>
    %c0_3 = arith.constant 0 : index
    %c0_4 = arith.constant 0 : index
    %3 = vector.load %arg3[%c0_3, %c0_4] : memref<1x128xf32, #tpu.memory_space<vmem>>, vector<1x128xf32>
    %4 = vector.broadcast %3 : vector<1x128xf32> to vector<200x128xf32>
    %5 = arith.addf %2, %4 : vector<200x128xf32>
    %cst_5 = arith.constant 0.000000e+00 : f32
    %6 = vector.broadcast %cst_5 : f32 to vector<200x128xf32>
    %7 = arith.maximumf %5, %6 : vector<200x128xf32>
    %c0_6 = arith.constant 0 : index
    %c0_7 = arith.constant 0 : index
    %8 = vector.load %arg4[%c0_6, %c0_7] : memref<200x128xf32, #tpu.memory_space<vmem>>, vector<200x128xf32>
    tpu.vector_store %arg4[%c0_6, %c0_7], %7 {strides = array<i32>} : memref<200x128xf32, #tpu.memory_space<vmem>>, vector<200x128xf32>,
    return
  }
  func.func @transform_0(%arg0: i32) -> (i32, i32) {
    %c0_i32 = arith.constant 0 : i32
    %c0_i32_0 = arith.constant 0 : i32
    return %arg0, %c0_i32 : i32, i32
  }
  func.func @transform_1(%arg0: i32) -> (i32, i32) {
    %c0_i32 = arith.constant 0 : i32
    %c0_i32_0 = arith.constant 0 : i32
    %c0_i32_1 = arith.constant 0 : i32
    return %c0_i32, %c0_i32_0 : i32, i32
  }
  func.func @transform_2(%arg0: i32) -> (i32, i32) {
    %c0_i32 = arith.constant 0 : i32
    %c0_i32_0 = arith.constant 0 : i32
    %c0_i32_1 = arith.constant 0 : i32
    return %c0_i32, %c0_i32_0 : i32, i32
  }
  func.func @transform_3(%arg0: i32) -> (i32, i32) {
    %c0_i32 = arith.constant 0 : i32
    %c0_i32_0 = arith.constant 0 : i32
    return %arg0, %c0_i32 : i32, i32
  }
}

module attributes {stable_mosaic.version = 11 : i64} {
  func.func @_matmul_bias_relu_kernel(%arg0: i32, %arg1: memref<32x512xbf16, #tpu.memory_space<vmem>>, %arg2: memref<512x128xbf16, #tpu.memory_space<vmem>>, %arg3: memref<1x128xf32, #tpu.memory_space<vmem>>, %arg4: memref<32x128xf32, #tpu.memory_space<vmem>>) attributes {dimension_semantics = [#tpu.dimension_semantics<parallel>], iteration_bounds = array<i64: 1>, scalar_prefetch = 0 : i64, scratch_operands = 0 : i64, tpu.core_type = #tpu.core_type<tc>, window_params = [{transform_indices = @transform_0, window_bounds = array<i64: 32, 512>}, {pipeline_mode = #tpu.pipeline_mode<synchronous>, transform_indices = @transform_1, window_bounds = array<i64: 512, 128>}, {pipeline_mode = #tpu.pipeline_mode<synchronous>, transform_indices = @transform_2, window_bounds = array<i64: 1, 128>}, {transform_indices = @transform_3, window_bounds = array<i64: 32, 128>}]} {
    %c0 = arith.constant 0 : index
    %c0_0 = arith.constant 0 : index
    %0 = vector.load %arg1[%c0, %c0_0] : memref<32x512xbf16, #tpu.memory_space<vmem>>, vector<32x512xbf16>
    %c0_1 = arith.constant 0 : index
    %c0_2 = arith.constant 0 : index
    %1 = vector.load %arg2[%c0_1, %c0_2] : memref<512x128xbf16, #tpu.memory_space<vmem>>, vector<512x128xbf16>
    %cst = arith.constant dense<0.000000e+00> : vector<32x128xf32>
    %2 = tpu.matmul %0, %1, %cst {dimension_numbers = #tpu.dot_dimension_numbers<[1], [0], [0], [1], [0, 0, 1, 1], [], []>} : vector<32x512xbf16>, vector<512x128xbf16>, vector<32x128xf32> -> vector<32x128xf32>
    %c0_3 = arith.constant 0 : index
    %c0_4 = arith.constant 0 : index
    %3 = vector.load %arg3[%c0_3, %c0_4] : memref<1x128xf32, #tpu.memory_space<vmem>>, vector<1x128xf32>
    %4 = vector.broadcast %3 : vector<1x128xf32> to vector<32x128xf32>
    %5 = arith.addf %2, %4 : vector<32x128xf32>
    %cst_5 = arith.constant 0.000000e+00 : f32
    %6 = vector.broadcast %cst_5 : f32 to vector<32x128xf32>
    %7 = arith.maximumf %5, %6 : vector<32x128xf32>
    %c0_6 = arith.constant 0 : index
    %c0_7 = arith.constant 0 : index
    %8 = vector.load %arg4[%c0_6, %c0_7] : memref<32x128xf32, #tpu.memory_space<vmem>>, vector<32x128xf32>
    tpu.vector_store %arg4[%c0_6, %c0_7], %7 {strides = array<i32>} : memref<32x128xf32, #tpu.memory_space<vmem>>, vector<32x128xf32>,
    return
  }
  func.func @transform_0(%arg0: i32) -> (i32, i32) {
    %c0_i32 = arith.constant 0 : i32
    %c0_i32_0 = arith.constant 0 : i32
    return %arg0, %c0_i32 : i32, i32
  }
  func.func @transform_1(%arg0: i32) -> (i32, i32) {
    %c0_i32 = arith.constant 0 : i32
    %c0_i32_0 = arith.constant 0 : i32
    %c0_i32_1 = arith.constant 0 : i32
    return %c0_i32, %c0_i32_0 : i32, i32
  }
  func.func @transform_2(%arg0: i32) -> (i32, i32) {
    %c0_i32 = arith.constant 0 : i32
    %c0_i32_0 = arith.constant 0 : i32
    %c0_i32_1 = arith.constant 0 : i32
    return %c0_i32, %c0_i32_0 : i32, i32
  }
  func.func @transform_3(%arg0: i32) -> (i32, i32) {
    %c0_i32 = arith.constant 0 : i32
    %c0_i32_0 = arith.constant 0 : i32
    return %arg0, %c0_i32 : i32, i32
  }
}

module attributes {stable_mosaic.version = 11 : i64} {
  func.func @_matmul_bias_relu_kernel(%arg0: i32, %arg1: memref<8x576xbf16, #tpu.memory_space<vmem>>, %arg2: memref<576x128xbf16, #tpu.memory_space<vmem>>, %arg3: memref<1x128xf32, #tpu.memory_space<vmem>>, %arg4: memref<8x128xf32, #tpu.memory_space<vmem>>) attributes {dimension_semantics = [#tpu.dimension_semantics<parallel>], iteration_bounds = array<i64: 1>, scalar_prefetch = 0 : i64, scratch_operands = 0 : i64, tpu.core_type = #tpu.core_type<tc>, window_params = [{transform_indices = @transform_0, window_bounds = array<i64: 8, 576>}, {pipeline_mode = #tpu.pipeline_mode<synchronous>, transform_indices = @transform_1, window_bounds = array<i64: 576, 128>}, {pipeline_mode = #tpu.pipeline_mode<synchronous>, transform_indices = @transform_2, window_bounds = array<i64: 1, 128>}, {transform_indices = @transform_3, window_bounds = array<i64: 8, 128>}]} {
    %c0 = arith.constant 0 : index
    %c0_0 = arith.constant 0 : index
    %0 = vector.load %arg1[%c0, %c0_0] : memref<8x576xbf16, #tpu.memory_space<vmem>>, vector<8x576xbf16>
    %c0_1 = arith.constant 0 : index
    %c0_2 = arith.constant 0 : index
    %1 = vector.load %arg2[%c0_1, %c0_2] : memref<576x128xbf16, #tpu.memory_space<vmem>>, vector<576x128xbf16>
    %cst = arith.constant dense<0.000000e+00> : vector<8x128xf32>
    %2 = tpu.matmul %0, %1, %cst {dimension_numbers = #tpu.dot_dimension_numbers<[1], [0], [0], [1], [0, 0, 1, 1], [], []>} : vector<8x576xbf16>, vector<576x128xbf16>, vector<8x128xf32> -> vector<8x128xf32>
    %c0_3 = arith.constant 0 : index
    %c0_4 = arith.constant 0 : index
    %3 = vector.load %arg3[%c0_3, %c0_4] : memref<1x128xf32, #tpu.memory_space<vmem>>, vector<1x128xf32>
    %4 = vector.broadcast %3 : vector<1x128xf32> to vector<8x128xf32>
    %5 = arith.addf %2, %4 : vector<8x128xf32>
    %cst_5 = arith.constant 0.000000e+00 : f32
    %6 = vector.broadcast %cst_5 : f32 to vector<8x128xf32>
    %7 = arith.maximumf %5, %6 : vector<8x128xf32>
    %c0_6 = arith.constant 0 : index
    %c0_7 = arith.constant 0 : index
    %8 = vector.load %arg4[%c0_6, %c0_7] : memref<8x128xf32, #tpu.memory_space<vmem>>, vector<8x128xf32>
    tpu.vector_store %arg4[%c0_6, %c0_7], %7 {strides = array<i32>} : memref<8x128xf32, #tpu.memory_space<vmem>>, vector<8x128xf32>,
    return
  }
  func.func @transform_0(%arg0: i32) -> (i32, i32) {
    %c0_i32 = arith.constant 0 : i32
    %c0_i32_0 = arith.constant 0 : i32
    return %arg0, %c0_i32 : i32, i32
  }
  func.func @transform_1(%arg0: i32) -> (i32, i32) {
    %c0_i32 = arith.constant 0 : i32
    %c0_i32_0 = arith.constant 0 : i32
    %c0_i32_1 = arith.constant 0 : i32
    return %c0_i32, %c0_i32_0 : i32, i32
  }
  func.func @transform_2(%arg0: i32) -> (i32, i32) {
    %c0_i32 = arith.constant 0 : i32
    %c0_i32_0 = arith.constant 0 : i32
    %c0_i32_1 = arith.constant 0 : i32
    return %c0_i32, %c0_i32_0 : i32, i32
  }
  func.func @transform_3(%arg0: i32) -> (i32, i32) {
    %c0_i32 = arith.constant 0 : i32
    %c0_i32_0 = arith.constant 0 : i32
    return %arg0, %c0_i32 : i32, i32
  }
}

module attributes {stable_mosaic.version = 11 : i64} {
  func.func @_fused_head_kernel(%arg0: memref<2x256xbf16, #tpu.memory_space<vmem>>, %arg1: memref<256x512xbf16, #tpu.memory_space<vmem>>, %arg2: memref<1x512xf32, #tpu.memory_space<vmem>>, %arg3: memref<512x48xf32, #tpu.memory_space<vmem>>, %arg4: memref<512x18xf32, #tpu.memory_space<vmem>>, %arg5: memref<48x18xf32, #tpu.memory_space<vmem>>, %arg6: memref<1x48xf32, #tpu.memory_space<vmem>>, %arg7: memref<1x18xf32, #tpu.memory_space<vmem>>, %arg8: memref<2x18xf32, #tpu.memory_space<vmem>>) attributes {dimension_semantics = [], scalar_prefetch = 0 : i64, scratch_operands = 0 : i64, tpu.core_type = #tpu.core_type<tc>} {
    %c0 = arith.constant 0 : index
    %c0_0 = arith.constant 0 : index
    %0 = vector.load %arg0[%c0, %c0_0] : memref<2x256xbf16, #tpu.memory_space<vmem>>, vector<2x256xbf16>
    %c0_1 = arith.constant 0 : index
    %c0_2 = arith.constant 0 : index
    %1 = vector.load %arg1[%c0_1, %c0_2] : memref<256x512xbf16, #tpu.memory_space<vmem>>, vector<256x512xbf16>
    %cst = arith.constant dense<0.000000e+00> : vector<2x512xf32>
    %2 = tpu.matmul %0, %1, %cst {dimension_numbers = #tpu.dot_dimension_numbers<[1], [0], [0], [1], [0, 0, 1, 1], [], []>} : vector<2x256xbf16>, vector<256x512xbf16>, vector<2x512xf32> -> vector<2x512xf32>
    %c0_3 = arith.constant 0 : index
    %c0_4 = arith.constant 0 : index
    %3 = vector.load %arg2[%c0_3, %c0_4] : memref<1x512xf32, #tpu.memory_space<vmem>>, vector<1x512xf32>
    %4 = vector.broadcast %3 : vector<1x512xf32> to vector<2x512xf32>
    %5 = arith.addf %2, %4 : vector<2x512xf32>
    %cst_5 = arith.constant 0.000000e+00 : f32
    %6 = vector.broadcast %cst_5 : f32 to vector<2x512xf32>
    %7 = arith.maximumf %5, %6 : vector<2x512xf32>
    %c0_6 = arith.constant 0 : index
    %c0_7 = arith.constant 0 : index
    %8 = vector.load %arg3[%c0_6, %c0_7] : memref<512x48xf32, #tpu.memory_space<vmem>>, vector<512x48xf32>
    %c0_8 = arith.constant 0 : index
    %c0_9 = arith.constant 0 : index
    %9 = vector.load %arg5[%c0_8, %c0_9] : memref<48x18xf32, #tpu.memory_space<vmem>>, vector<48x18xf32>
    %cst_10 = arith.constant dense<0.000000e+00> : vector<512x18xf32>
    %10 = tpu.matmul %8, %9, %cst_10 {dimension_numbers = #tpu.dot_dimension_numbers<[1], [0], [0], [1], [0, 0, 1, 1], [], []>} : vector<512x48xf32>, vector<48x18xf32>, vector<512x18xf32> -> vector<512x18xf32>
    %c0_11 = arith.constant 0 : index
    %c0_12 = arith.constant 0 : index
    %11 = vector.load %arg4[%c0_11, %c0_12] : memref<512x18xf32, #tpu.memory_space<vmem>>, vector<512x18xf32>
    %12 = arith.addf %10, %11 : vector<512x18xf32>
    %c0_13 = arith.constant 0 : index
    %c0_14 = arith.constant 0 : index
    %13 = vector.load %arg6[%c0_13, %c0_14] : memref<1x48xf32, #tpu.memory_space<vmem>>, vector<1x48xf32>
    %c0_15 = arith.constant 0 : index
    %c0_16 = arith.constant 0 : index
    %14 = vector.load %arg5[%c0_15, %c0_16] : memref<48x18xf32, #tpu.memory_space<vmem>>, vector<48x18xf32>
    %cst_17 = arith.constant dense<0.000000e+00> : vector<1x18xf32>
    %15 = tpu.matmul %13, %14, %cst_17 {dimension_numbers = #tpu.dot_dimension_numbers<[1], [0], [0], [1], [0, 0, 1, 1], [], []>} : vector<1x48xf32>, vector<48x18xf32>, vector<1x18xf32> -> vector<1x18xf32>
    %c0_18 = arith.constant 0 : index
    %c0_19 = arith.constant 0 : index
    %16 = vector.load %arg7[%c0_18, %c0_19] : memref<1x18xf32, #tpu.memory_space<vmem>>, vector<1x18xf32>
    %17 = arith.addf %15, %16 : vector<1x18xf32>
    %cst_20 = arith.constant dense<0.000000e+00> : vector<2x18xf32>
    %18 = tpu.matmul %7, %12, %cst_20 {dimension_numbers = #tpu.dot_dimension_numbers<[1], [0], [0], [1], [0, 0, 1, 1], [], []>} : vector<2x512xf32>, vector<512x18xf32>, vector<2x18xf32> -> vector<2x18xf32>
    %19 = vector.broadcast %17 : vector<1x18xf32> to vector<2x18xf32>
    %20 = arith.addf %18, %19 : vector<2x18xf32>
    %c0_21 = arith.constant 0 : index
    %c0_22 = arith.constant 0 : index
    %21 = vector.load %arg8[%c0_21, %c0_22] : memref<2x18xf32, #tpu.memory_space<vmem>>, vector<2x18xf32>
    tpu.vector_store %arg8[%c0_21, %c0_22], %20 {strides = array<i32>} : memref<2x18xf32, #tpu.memory_space<vmem>>, vector<2x18xf32>,
    return
  }
}

</mosaic_0001>

<bundles_post_ra>
// kernel: hyper_dqn_forward.4
= control target key start
LH: loop header
LB: loop body
LE: loop exit
PB: predicated region body
PF: predicated region fallthrough
CT: control target
= control target key end

     0   :  { %s947_s1 = inlined_call_operand.vmem [shape: bf16[256,128], index: 1, kind: input, shape index: {}]   ;;  %s948_s0 = inlined_call_operand.vmem [shape: bf16[200,256], index: 0, kind: input, shape index: {}]   ;;  %s949_s2 = inlined_call_operand.vmem [shape: f32[1,128], index: 2, kind: input, shape index: {}]   ;;  %s950_s3 = inlined_call_operand.vmem [shape: f32[200,128], index: 3, kind: output, shape index: {}]  }
   0x1   :  { %v645_v0 = vld [vmem:[%s947_s1 + $0x40] sm:$0xff]   ;;  %v647_v2 = vld [vmem:[%s947_s1 + $0x48] sm:$0xff]   ;;  %v649_v4 = vld [vmem:[%s947_s1 + $0x50] sm:$0xff]  }
   0x2   :  { %v646_v1 = vld [vmem:[%s947_s1] sm:$0xff]   ;;  %535 = vmatprep.subr.bf16.mxu0 %v645_v0  ;;  %629 = vmatprep.subr.bf16.mxu1 %v645_v0  ;;  %v648_v3 = vld [vmem:[%s947_s1 + $0x8] sm:$0xff]   ;;  %v650_v5 = vld [vmem:[%s947_s1 + $0x10] sm:$0xff]  }
   0x3   :  { %536 = vmatpush3.bf16.msra.mxu0 %v646_v1  ;;  %637 = vmatpush3.bf16.msra.mxu1 %v646_v1  ;;  %v651_v6 = vld [vmem:[%s947_s1 + $0x58] sm:$0xff]   ;;  %v653_v8 = vld [vmem:[%s947_s1 + $0x60] sm:$0xff]   ;;  %v655_v10 = vld [vmem:[%s947_s1 + $0x68] sm:$0xff]  }
   0x4   :  { %537 = vmatprep.subr.bf16.mxu0 %v647_v2  ;;  %630 = vmatprep.subr.bf16.mxu1 %v647_v2  ;;  %v652_v7 = vld [vmem:[%s947_s1 + $0x18] sm:$0xff]   ;;  %v654_v9 = vld [vmem:[%s947_s1 + $0x20] sm:$0xff]   ;;  %v656_v13 = vld [vmem:[%s947_s1 + $0x28] sm:$0xff]  }
   0x5   :  { %v663_v11 = vld [vmem:[%s948_s0 + $0x4] ss:$8 sps:$4 sm:$0xff]   ;;  %v666_v12 = vld [vmem:[%s948_s0 + $0x74] ss:$8 sps:$4 sm:$0xff]   ;;  %v661_v18 = vld [vmem:[%s948_s0] ss:$8 sps:$4 sm:$0xff]  }
   0x6   :  { %v657_v14 = vld [vmem:[%s947_s1 + $0x70] sm:$0xff]   ;;  %334 = vmatprep.mubr.bf16.mxu0 %v663_v11  ;;  %390 = vmatprep.mubr.bf16.mxu1 %v666_v12  ;;  %v659_v16 = vld [vmem:[%s947_s1 + $0x78] sm:$0xff]   ;;  %v670_v21 = vld [vmem:[%s948_s0 + $0x84] ss:$8 sps:$4 sm:$0xff]  }
   0x7   :  { %538 = vmatpush3.bf16.msra.mxu0 %v648_v3  ;;  %638 = vmatpush3.bf16.msra.mxu1 %v648_v3  ;;  %v658_v15 = vld [vmem:[%s947_s1 + $0x30] sm:$0xff]   ;;  %v660_v17 = vld [vmem:[%s947_s1 + $0x38] sm:$0xff]   ;;  %v674_v23 = vld [vmem:[%s948_s0 + $0x80] ss:$8 sps:$4 sm:$0xff]  }
   0x8   :  { %539 = vmatprep.subr.bf16.mxu0 %v649_v4  ;;  %631 = vmatprep.subr.bf16.mxu1 %v649_v4  ;;  %v664_v19 = vld [vmem:[%s948_s0 + $0x70] ss:$8 sps:$4 sm:$0xff]   ;;  %v667_v20 = vld [vmem:[%s948_s0 + $0x14] ss:$8 sps:$4 sm:$0xff]   ;;  %v672_v24 = vld [vmem:[%s948_s0 + $0x24] ss:$8 sps:$4 sm:$0xff]  }
   0x9   :  { %v669_v22 = vld [vmem:[%s948_s0 + $0x10] ss:$8 sps:$4 sm:$0xff]   ;;  %v676_v25 = vld [vmem:[%s948_s0 + $0x94] ss:$8 sps:$4 sm:$0xff]   ;;  %v675_v26 = vld [vmem:[%s948_s0 + $0x20] ss:$8 sps:$4 sm:$0xff]  }
   0xa   :  { %v680_v27 = vld [vmem:[%s948_s0 + $0x90] ss:$8 sps:$4 sm:$0xff]   ;;  %v678_v28 = vld [vmem:[%s948_s0 + $0x34] ss:$8 sps:$4 sm:$0xff]   ;;  %v682_v29 = vld [vmem:[%s948_s0 + $0xa4] ss:$8 sps:$4 sm:$0xff]  }
   0xb   :  { %540 = vmatpush3.bf16.msra.mxu0 %v650_v5  ;;  %639 = vmatpush3.bf16.msra.mxu1 %v650_v5  ;;  %v681_v30 = vld [vmem:[%s948_s0 + $0x30] ss:$8 sps:$4 sm:$0xff]   ;;  %v686_v31 = vld [vmem:[%s948_s0 + $0xa0] ss:$8 sps:$4 sm:$0xff]   ;;  %v684_v32 = vld [vmem:[%s948_s0 + $0x44] ss:$8 sps:$4 sm:$0xff]  }
   0xc   :  { %541 = vmatprep.subr.bf16.mxu0 %v651_v6  ;;  %632 = vmatprep.subr.bf16.mxu1 %v651_v6  ;;  %v688_v33 = vld [vmem:[%s948_s0 + $0xb4] ss:$8 sps:$4 sm:$0xff]   ;;  %v39_v34 = vld [vmem:[%s948_s0 + $0xc0] sm:$0xff]  ;;  %v692_v36 = vld [vmem:[%s948_s0 + $0xb0] ss:$8 sps:$4 sm:$0xff]  }
   0xd   :  { %v687_v35 = vld [vmem:[%s948_s0 + $0x40] ss:$8 sps:$4 sm:$0xff]   ;;  %v690_v37 = vld [vmem:[%s948_s0 + $0x54] ss:$8 sps:$4 sm:$0xff]   ;;  %v518_v38 = vcombine.high %v39_v34, %v39_v34  ;;  %v693_v39 = vld [vmem:[%s948_s0 + $0x50] ss:$8 sps:$4 sm:$0xff]   ;;  %v517_v40 = vcombine.low %v39_v34, %v39_v34 }
   0xe   :  { %v695_v41 = vld [vmem:[%s948_s0 + $0x64] ss:$8 sps:$4 sm:$0xff]   ;;  %v698_v42 = vld [vmem:[%s948_s0 + $0x60] ss:$8 sps:$4 sm:$0xff]  }
   0xf   :  { %542 = vmatpush3.bf16.msra.mxu0 %v652_v7  ;;  %640 = vmatpush3.bf16.msra.mxu1 %v652_v7  ;;  %v845_v45 = vld [vmem:[%s949_s2] ss:$0 sm:$0xff] }
  0x10   :  { %543 = vmatprep.subr.bf16.mxu0 %v653_v8  ;;  %633 = vmatprep.subr.bf16.mxu1 %v653_v8 }
  0x13   :  { %544 = vmatpush3.bf16.msra.mxu0 %v654_v9  ;;  %641 = vmatpush3.bf16.msra.mxu1 %v654_v9 }
  0x14   :  { %545 = vmatprep.subr.bf16.mxu0 %v655_v10  ;;  %634 = vmatprep.subr.bf16.mxu1 %v655_v10 }
  0x17   :  { %546 = vmatpush3.bf16.msra.mxu0 %v656_v13  ;;  %642 = vmatpush3.bf16.msra.mxu1 %v656_v13 }
  0x18   :  { %547 = vmatprep.subr.bf16.mxu0 %v657_v14  ;;  %635 = vmatprep.subr.bf16.mxu1 %v657_v14 }
  0x1b   :  { %548 = vmatpush3.bf16.msra.mxu0 %v658_v15  ;;  %643 = vmatpush3.bf16.msra.mxu1 %v658_v15 }
  0x1c   :  { %549 = vmatprep.subr.bf16.mxu0 %v659_v16  ;;  %636 = vmatprep.subr.bf16.mxu1 %v659_v16 }
  0x1f   :  { %550 = vmatpush3.bf16.msra.mxu0 %v660_v17  ;;  %644 = vmatpush3.bf16.msra.mxu1 %v660_v17 }
  0x22   :  { %335 = vmatmul.mubr.bf16.vlgmr.msra.gmra.mrb[0].mxu0 %v661_v18  ;;  %391 = vmatmul.mubr.bf16.vlgmr.msra.gmra.mrb[0].mxu1 %v664_v19 }
  0x23   :  { %342 = vmatprep.mubr.bf16.mxu0 %v667_v20  ;;  %398 = vmatprep.mubr.bf16.mxu1 %v670_v21 }
  0x2a   :  { %343 = vmatmul.mubr.bf16.gmra.mrb[4].mxu0 %v669_v22  ;;  %399 = vmatmul.mubr.bf16.gmra.mrb[4].mxu1 %v674_v23 }
  0x2b   :  { %350 = vmatprep.mubr.bf16.mxu0 %v672_v24  ;;  %406 = vmatprep.mubr.bf16.mxu1 %v676_v25 }
  0x32   :  { %351 = vmatmul.mubr.bf16.gmra.mrb[8].mxu0 %v675_v26  ;;  %407 = vmatmul.mubr.bf16.gmra.mrb[8].mxu1 %v680_v27 }
  0x33   :  { %358 = vmatprep.mubr.bf16.mxu0 %v678_v28  ;;  %414 = vmatprep.mubr.bf16.mxu1 %v682_v29 }
  0x3a   :  { %359 = vmatmul.mubr.bf16.gmra.mrb[12].mxu0 %v681_v30  ;;  %415 = vmatmul.mubr.bf16.gmra.mrb[12].mxu1 %v686_v31 }
  0x3b   :  { %366 = vmatprep.mubr.bf16.mxu0 %v684_v32  ;;  %422 = vmatprep.mubr.bf16.mxu1 %v688_v33 }
  0x42   :  { %367 = vmatmul.mubr.bf16.gmra.mrb[16].mxu0 %v687_v35  ;;  %423 = vmatmul.mubr.bf16.gmra.mrb[16].mxu1 %v692_v36 }
  0x43   :  { %374 = vmatprep.mubr.bf16.mxu0 %v690_v37  ;;  %430 = vmatprep.mubr.bf16.mxu1 %v518_v38 }
  0x4a   :  { %375 = vmatmul.mubr.bf16.gmra.mrb[20].mxu0 %v693_v39  ;;  %431 = vmatmul.mubr.bf16.gmra.mrb[20].mxu1 %v517_v40 }
  0x4b   :  { %382 = vmatprep.mubr.bf16.mxu0 %v695_v41 }
  0x52   :  { %383 = vmatmul.mubr.bf16.gmra.mrb[24].mxu0 %v698_v42 }
  0xf5   :  { %v551_v43 = vpop.f32.mrb[0].mxu0  ;;  %v593_v44 = vpop.f32.mrb[0].mxu1 }
  0xf6   :  { %v552_v46 = vpop.f32.mrb[1].mxu0  ;;  %v594_v47 = vpop.f32.mrb[1].mxu1 }
  0xf7   :  { %v553_v48 = vadd.f32 %v552_v46, %v551_v43  ;;  %v554_v49 = vpop.f32.mrb[2].mxu0  ;;  %v595_v50 = vadd.f32 %v594_v47, %v593_v44  ;;  %v596_v51 = vpop.f32.mrb[2].mxu1 }
  0xf8   :  { %v555_v52 = vpop.f32.mrb[3].mxu0  ;;  %v597_v53 = vpop.f32.mrb[3].mxu1 }
  0xf9   :  { %v337_v54 = vadd.f32 %v553_v48, %v845_v45  ;;  %v556_v55 = vadd.f32 %v555_v52, %v554_v49  ;;  %v393_v56 = vadd.f32 %v595_v50, %v845_v45  ;;  %v598_v57 = vadd.f32 %v597_v53, %v596_v51 }
  0xfb   :  { %v438_v58 = vmax.f32 %v337_v54, 0.0  ;;  %v340_v59 = vadd.f32 %v556_v55, %v845_v45  ;;  %v452_v60 = vmax.f32 %v393_v56, 0.0  ;;  %v396_v61 = vadd.f32 %v598_v57, %v845_v45 }
  0xfd   :  { %463 = vst [vmem:[%s950_s3] sm:$0xff] %v438_v58  ;;  %v439_v62 = vmax.f32 %v340_v59, 0.0  ;;  %v557_v63 = vpop.f32.mrb[4].mxu0  ;;  %477 = vst [vmem:[%s950_s3 + $0x70] sm:$0xff] %v452_v60  ;;  %v453_v0 = vmax.f32 %v396_v61, 0.0  ;;  %v599_v1 = vpop.f32.mrb[4].mxu1 }
  0xfe   :  { %v558_v2 = vpop.f32.mrb[5].mxu0  ;;  %v600_v3 = vpop.f32.mrb[5].mxu1 }
  0xff   :  { %464 = vst [vmem:[%s950_s3 + $0x8] sm:$0xff] %v439_v62  ;;  %v559_v4 = vadd.f32 %v558_v2, %v557_v63  ;;  %v560_v5 = vpop.f32.mrb[6].mxu0  ;;  %478 = vst [vmem:[%s950_s3 + $0x78] sm:$0xff] %v453_v0  ;;  %v601_v6 = vadd.f32 %v600_v3, %v599_v1  ;;  %v602_v7 = vpop.f32.mrb[6].mxu1 }
 0x100   :  { %v561_v8 = vpop.f32.mrb[7].mxu0  ;;  %v603_v9 = vpop.f32.mrb[7].mxu1 }
 0x101   :  { %v345_v10 = vadd.f32 %v559_v4, %v845_v45  ;;  %v562_v11 = vadd.f32 %v561_v8, %v560_v5  ;;  %v401_v12 = vadd.f32 %v601_v6, %v845_v45  ;;  %v604_v13 = vadd.f32 %v603_v9, %v602_v7 }
 0x103   :  { %v440_v14 = vmax.f32 %v345_v10, 0.0  ;;  %v348_v15 = vadd.f32 %v562_v11, %v845_v45  ;;  %v454_v16 = vmax.f32 %v401_v12, 0.0  ;;  %v404_v17 = vadd.f32 %v604_v13, %v845_v45 }
 0x105   :  { %465 = vst [vmem:[%s950_s3 + $0x10] sm:$0xff] %v440_v14  ;;  %v441_v18 = vmax.f32 %v348_v15, 0.0  ;;  %v563_v19 = vpop.f32.mrb[8].mxu0  ;;  %479 = vst [vmem:[%s950_s3 + $0x80] sm:$0xff] %v454_v16  ;;  %v455_v20 = vmax.f32 %v404_v17, 0.0  ;;  %v605_v21 = vpop.f32.mrb[8].mxu1 }
 0x106   :  { %v564_v22 = vpop.f32.mrb[9].mxu0  ;;  %v606_v23 = vpop.f32.mrb[9].mxu1 }
 0x107   :  { %466 = vst [vmem:[%s950_s3 + $0x18] sm:$0xff] %v441_v18  ;;  %v565_v24 = vadd.f32 %v564_v22, %v563_v19  ;;  %v566_v25 = vpop.f32.mrb[10].mxu0  ;;  %480 = vst [vmem:[%s950_s3 + $0x88] sm:$0xff] %v455_v20  ;;  %v607_v26 = vadd.f32 %v606_v23, %v605_v21  ;;  %v608_v27 = vpop.f32.mrb[10].mxu1 }
 0x108   :  { %v567_v28 = vpop.f32.mrb[11].mxu0  ;;  %v609_v29 = vpop.f32.mrb[11].mxu1 }
 0x109   :  { %v353_v30 = vadd.f32 %v565_v24, %v845_v45  ;;  %v568_v31 = vadd.f32 %v567_v28, %v566_v25  ;;  %v409_v32 = vadd.f32 %v607_v26, %v845_v45  ;;  %v610_v33 = vadd.f32 %v609_v29, %v608_v27 }
 0x10b   :  { %v442_v34 = vmax.f32 %v353_v30, 0.0  ;;  %v356_v35 = vadd.f32 %v568_v31, %v845_v45  ;;  %v456_v36 = vmax.f32 %v409_v32, 0.0  ;;  %v412_v37 = vadd.f32 %v610_v33, %v845_v45 }
 0x10d   :  { %467 = vst [vmem:[%s950_s3 + $0x20] sm:$0xff] %v442_v34  ;;  %v443_v38 = vmax.f32 %v356_v35, 0.0  ;;  %v569_v39 = vpop.f32.mrb[12].mxu0  ;;  %481 = vst [vmem:[%s950_s3 + $0x90] sm:$0xff] %v456_v36  ;;  %v457_v40 = vmax.f32 %v412_v37, 0.0  ;;  %v611_v41 = vpop.f32.mrb[12].mxu1 }
 0x10e   :  { %v570_v42 = vpop.f32.mrb[13].mxu0  ;;  %v612_v43 = vpop.f32.mrb[13].mxu1 }
 0x10f   :  { %468 = vst [vmem:[%s950_s3 + $0x28] sm:$0xff] %v443_v38  ;;  %v571_v44 = vadd.f32 %v570_v42, %v569_v39  ;;  %v572_v46 = vpop.f32.mrb[14].mxu0  ;;  %482 = vst [vmem:[%s950_s3 + $0x98] sm:$0xff] %v457_v40  ;;  %v613_v47 = vadd.f32 %v612_v43, %v611_v41  ;;  %v614_v48 = vpop.f32.mrb[14].mxu1 }
 0x110   :  { %v573_v49 = vpop.f32.mrb[15].mxu0  ;;  %v615_v50 = vpop.f32.mrb[15].mxu1 }
 0x111   :  { %v361_v51 = vadd.f32 %v571_v44, %v845_v45  ;;  %v574_v52 = vadd.f32 %v573_v49, %v572_v46  ;;  %v417_v53 = vadd.f32 %v613_v47, %v845_v45  ;;  %v616_v54 = vadd.f32 %v615_v50, %v614_v48 }
 0x113   :  { %v444_v55 = vmax.f32 %v361_v51, 0.0  ;;  %v364_v56 = vadd.f32 %v574_v52, %v845_v45  ;;  %v458_v57 = vmax.f32 %v417_v53, 0.0  ;;  %v420_v58 = vadd.f32 %v616_v54, %v845_v45 }
 0x115   :  { %469 = vst [vmem:[%s950_s3 + $0x30] sm:$0xff] %v444_v55  ;;  %v445_v59 = vmax.f32 %v364_v56, 0.0  ;;  %v575_v60 = vpop.f32.mrb[16].mxu0  ;;  %483 = vst [vmem:[%s950_s3 + $0xa0] sm:$0xff] %v458_v57  ;;  %v459_v61 = vmax.f32 %v420_v58, 0.0  ;;  %v617_v62 = vpop.f32.mrb[16].mxu1 }
 0x116   :  { %v576_v63 = vpop.f32.mrb[17].mxu0  ;;  %v618_v0 = vpop.f32.mrb[17].mxu1 }
 0x117   :  { %470 = vst [vmem:[%s950_s3 + $0x38] sm:$0xff] %v445_v59  ;;  %v577_v1 = vadd.f32 %v576_v63, %v575_v60  ;;  %v578_v2 = vpop.f32.mrb[18].mxu0  ;;  %484 = vst [vmem:[%s950_s3 + $0xa8] sm:$0xff] %v459_v61  ;;  %v619_v3 = vadd.f32 %v618_v0, %v617_v62  ;;  %v620_v4 = vpop.f32.mrb[18].mxu1 }
 0x118   :  { %v579_v5 = vpop.f32.mrb[19].mxu0  ;;  %v621_v6 = vpop.f32.mrb[19].mxu1 }
 0x119   :  { %v369_v7 = vadd.f32 %v577_v1, %v845_v45  ;;  %v580_v8 = vadd.f32 %v579_v5, %v578_v2  ;;  %v425_v9 = vadd.f32 %v619_v3, %v845_v45  ;;  %v622_v10 = vadd.f32 %v621_v6, %v620_v4 }
 0x11b   :  { %v446_v11 = vmax.f32 %v369_v7, 0.0  ;;  %v372_v12 = vadd.f32 %v580_v8, %v845_v45  ;;  %v460_v13 = vmax.f32 %v425_v9, 0.0  ;;  %v428_v14 = vadd.f32 %v622_v10, %v845_v45 }
 0x11d   :  { %471 = vst [vmem:[%s950_s3 + $0x40] sm:$0xff] %v446_v11  ;;  %v447_v15 = vmax.f32 %v372_v12, 0.0  ;;  %v581_v16 = vpop.f32.mrb[20].mxu0  ;;  %485 = vst [vmem:[%s950_s3 + $0xb0] sm:$0xff] %v460_v13  ;;  %v461_v17 = vmax.f32 %v428_v14, 0.0  ;;  %v623_v18 = vpop.f32.mrb[20].mxu1 }
 0x11e   :  { %v582_v19 = vpop.f32.mrb[21].mxu0  ;;  %v624_v20 = vpop.f32.mrb[21].mxu1 }
 0x11f   :  { %472 = vst [vmem:[%s950_s3 + $0x48] sm:$0xff] %v447_v15  ;;  %v583_v21 = vadd.f32 %v582_v19, %v581_v16  ;;  %v584_v22 = vpop.f32.mrb[22].mxu0  ;;  %486 = vst [vmem:[%s950_s3 + $0xb8] sm:$0xff] %v461_v17  ;;  %v625_v23 = vadd.f32 %v624_v20, %v623_v18  ;;  %v626_v24 = vpop.f32.mrb[22].mxu1 }
 0x120   :  { %v585_v25 = vpop.f32.mrb[23].mxu0  ;;  %v627_v26 = vpop.f32.mrb[23].mxu1 }
 0x121   :  { %v377_v27 = vadd.f32 %v583_v21, %v845_v45  ;;  %v586_v28 = vadd.f32 %v585_v25, %v584_v22  ;;  %v433_v29 = vadd.f32 %v625_v23, %v845_v45 }
 0x123   :  { %v448_v30 = vmax.f32 %v377_v27, 0.0  ;;  %v380_v31 = vadd.f32 %v586_v28, %v845_v45  ;;  %v462_v32 = vmax.f32 %v433_v29, 0.0 }
 0x125   :  { %473 = vst [vmem:[%s950_s3 + $0x50] sm:$0xff] %v448_v30  ;;  %v449_v33 = vmax.f32 %v380_v31, 0.0  ;;  %v587_v34 = vpop.f32.mrb[24].mxu0  ;;  %487 = vst [vmem:[%s950_s3 + $0xc0] sm:$0xff] %v462_v32 }
 0x126   :  { %v588_v35 = vpop.f32.mrb[25].mxu0 }
 0x127   :  { %474 = vst [vmem:[%s950_s3 + $0x58] sm:$0xff] %v449_v33  ;;  %v589_v36 = vadd.f32 %v588_v35, %v587_v34  ;;  %v590_v37 = vpop.f32.mrb[26].mxu0 }
 0x128   :  { %v591_v38 = vpop.f32.mrb[27].mxu0 }
 0x129   :  { %v385_v39 = vadd.f32 %v589_v36, %v845_v45  ;;  %v592_v40 = vadd.f32 %v591_v38, %v590_v37 }
 0x12b   :  { %v450_v41 = vmax.f32 %v385_v39, 0.0  ;;  %v388_v42 = vadd.f32 %v592_v40, %v845_v45 }
 0x12d   :  { %475 = vst [vmem:[%s950_s3 + $0x60] sm:$0xff] %v450_v41  ;;  %v451_v43 = vmax.f32 %v388_v42, 0.0 }
 0x12f   :  { %476 = vst [vmem:[%s950_s3 + $0x68] sm:$0xff] %v451_v43 }

// kernel: hyper_dqn_forward.5
= control target key start
LH: loop header
LB: loop body
LE: loop exit
PB: predicated region body
PF: predicated region fallthrough
CT: control target
= control target key end

     0   :  { %s732_s1 = inlined_call_operand.vmem [shape: bf16[512,128], index: 1, kind: input, shape index: {}]   ;;  %s733_s0 = inlined_call_operand.vmem [shape: bf16[32,512], index: 0, kind: input, shape index: {}]   ;;  %s734_s2 = inlined_call_operand.vmem [shape: f32[1,128], index: 2, kind: input, shape index: {}]   ;;  %s735_s3 = inlined_call_operand.vmem [shape: f32[32,128], index: 3, kind: output, shape index: {}]  }
   0x1   :  { %v533_v0 = vld [vmem:[%s732_s1 + $0x40] sm:$0xff]   ;;  %v537_v4 = vld [vmem:[%s732_s1 + $0x48] sm:$0xff]   ;;  %v541_v8 = vld [vmem:[%s732_s1 + $0x50] sm:$0xff]  }
   0x2   :  { %v534_v1 = vld [vmem:[%s732_s1 + $0xc0] sm:$0xff]   ;;  %477 = vmatprep.subr.bf16.mxu0 %v533_v0  ;;  %v538_v5 = vld [vmem:[%s732_s1 + $0xc8] sm:$0xff]   ;;  %v542_v9 = vld [vmem:[%s732_s1 + $0xd0] sm:$0xff]  }
   0x3   :  { %v535_v2 = vld [vmem:[%s732_s1] sm:$0xff]   ;;  %505 = vmatprep.subr.bf16.mxu1 %v534_v1  ;;  %v539_v6 = vld [vmem:[%s732_s1 + $0x8] sm:$0xff]   ;;  %v543_v10 = vld [vmem:[%s732_s1 + $0x10] sm:$0xff]  }
   0x4   :  { %v536_v3 = vld [vmem:[%s732_s1 + $0x80] sm:$0xff]   ;;  %478 = vmatpush3.bf16.msra.mxu0 %v535_v2  ;;  %v540_v7 = vld [vmem:[%s732_s1 + $0x88] sm:$0xff]   ;;  %v544_v11 = vld [vmem:[%s732_s1 + $0x90] sm:$0xff]  }
   0x5   :  { %506 = vmatpush3.bf16.msra.mxu1 %v536_v3  ;;  %479 = vmatprep.subr.bf16.mxu0 %v537_v4  ;;  %v545_v12 = vld [vmem:[%s732_s1 + $0x58] sm:$0xff]   ;;  %v549_v16 = vld [vmem:[%s732_s1 + $0x60] sm:$0xff]   ;;  %v553_v20 = vld [vmem:[%s732_s1 + $0x68] sm:$0xff]  }
   0x6   :  { %507 = vmatprep.subr.bf16.mxu1 %v538_v5  ;;  %v546_v13 = vld [vmem:[%s732_s1 + $0xd8] sm:$0xff]   ;;  %v550_v17 = vld [vmem:[%s732_s1 + $0xe0] sm:$0xff]   ;;  %v554_v21 = vld [vmem:[%s732_s1 + $0xe8] sm:$0xff]  }
   0x7   :  { %v547_v14 = vld [vmem:[%s732_s1 + $0x18] sm:$0xff]   ;;  %v551_v18 = vld [vmem:[%s732_s1 + $0x20] sm:$0xff]   ;;  %v555_v22 = vld [vmem:[%s732_s1 + $0x28] sm:$0xff]  }
   0x8   :  { %480 = vmatpush3.bf16.msra.mxu0 %v539_v6  ;;  %v548_v15 = vld [vmem:[%s732_s1 + $0x98] sm:$0xff]   ;;  %v552_v19 = vld [vmem:[%s732_s1 + $0xa0] sm:$0xff]   ;;  %v556_v23 = vld [vmem:[%s732_s1 + $0xa8] sm:$0xff]  }
   0x9   :  { %508 = vmatpush3.bf16.msra.mxu1 %v540_v7  ;;  %481 = vmatprep.subr.bf16.mxu0 %v541_v8  ;;  %v557_v24 = vld [vmem:[%s732_s1 + $0x70] sm:$0xff]   ;;  %v561_v28 = vld [vmem:[%s732_s1 + $0x78] sm:$0xff]   ;;  %v436_v42 = vld [vmem:[%s734_s2] ss:$0 sm:$0xff] }
   0xa   :  { %509 = vmatprep.subr.bf16.mxu1 %v542_v9  ;;  %v558_v25 = vld [vmem:[%s732_s1 + $0xf0] sm:$0xff]   ;;  %v562_v29 = vld [vmem:[%s732_s1 + $0xf8] sm:$0xff]  }
   0xb   :  { %v559_v26 = vld [vmem:[%s732_s1 + $0x30] sm:$0xff]   ;;  %v563_v30 = vld [vmem:[%s732_s1 + $0x38] sm:$0xff]  }
   0xc   :  { %482 = vmatpush3.bf16.msra.mxu0 %v543_v10  ;;  %v560_v27 = vld [vmem:[%s732_s1 + $0xb0] sm:$0xff]   ;;  %v564_v31 = vld [vmem:[%s732_s1 + $0xb8] sm:$0xff]  }
   0xd   :  { %510 = vmatpush3.bf16.msra.mxu1 %v544_v11  ;;  %483 = vmatprep.subr.bf16.mxu0 %v545_v12  ;;  %v565_v32 = vld [vmem:[%s733_s0] ss:$16 sps:$4 sm:$0xff]   ;;  %v567_v33 = vld [vmem:[%s733_s0 + $0x4] ss:$16 sps:$4 sm:$0xff]   ;;  %v568_v34 = vld [vmem:[%s733_s0 + $0x8] ss:$16 sps:$4 sm:$0xff]  }
   0xe   :  { %511 = vmatprep.subr.bf16.mxu1 %v546_v13  ;;  %v570_v35 = vld [vmem:[%s733_s0 + $0xc] ss:$16 sps:$4 sm:$0xff]   ;;  %358 = vmatprep.mubr.bf16.mxu0 %v567_v33  ;;  %v571_v36 = vld [vmem:[%s733_s0 + $0x24] ss:$16 sps:$4 sm:$0xff]   ;;  %v575_v38 = vld [vmem:[%s733_s0 + $0x20] ss:$16 sps:$4 sm:$0xff]  }
   0xf   :  { %407 = vmatprep.mubr.bf16.mxu1 %v570_v35  ;;  %v573_v37 = vld [vmem:[%s733_s0 + $0x2c] ss:$16 sps:$4 sm:$0xff]   ;;  %v576_v39 = vld [vmem:[%s733_s0 + $0x28] ss:$16 sps:$4 sm:$0xff]  }
  0x10   :  { %484 = vmatpush3.bf16.msra.mxu0 %v547_v14 }
  0x11   :  { %512 = vmatpush3.bf16.msra.mxu1 %v548_v15  ;;  %485 = vmatprep.subr.bf16.mxu0 %v549_v16 }
  0x12   :  { %513 = vmatprep.subr.bf16.mxu1 %v550_v17 }
  0x14   :  { %486 = vmatpush3.bf16.msra.mxu0 %v551_v18 }
  0x15   :  { %514 = vmatpush3.bf16.msra.mxu1 %v552_v19  ;;  %487 = vmatprep.subr.bf16.mxu0 %v553_v20 }
  0x16   :  { %515 = vmatprep.subr.bf16.mxu1 %v554_v21 }
  0x18   :  { %488 = vmatpush3.bf16.msra.mxu0 %v555_v22 }
  0x19   :  { %516 = vmatpush3.bf16.msra.mxu1 %v556_v23  ;;  %489 = vmatprep.subr.bf16.mxu0 %v557_v24 }
  0x1a   :  { %517 = vmatprep.subr.bf16.mxu1 %v558_v25 }
  0x1c   :  { %490 = vmatpush3.bf16.msra.mxu0 %v559_v26 }
  0x1d   :  { %518 = vmatpush3.bf16.msra.mxu1 %v560_v27  ;;  %491 = vmatprep.subr.bf16.mxu0 %v561_v28 }
  0x1e   :  { %519 = vmatprep.subr.bf16.mxu1 %v562_v29 }
  0x20   :  { %492 = vmatpush3.bf16.msra.mxu0 %v563_v30 }
  0x21   :  { %520 = vmatpush3.bf16.msra.mxu1 %v564_v31 }
  0x23   :  { %359 = vmatmul.mubr.bf16.vlgmr.msra.gmra.mrb[0].mxu0 %v565_v32 }
  0x24   :  { %408 = vmatmul.mubr.bf16.vlgmr.msra.gmra.mrb[0].mxu1 %v568_v34  ;;  %366 = vmatprep.mubr.bf16.mxu0 %v571_v36 }
  0x25   :  { %415 = vmatprep.mubr.bf16.mxu1 %v573_v37 }
  0x2b   :  { %367 = vmatmul.mubr.bf16.gmra.mrb[4].mxu0 %v575_v38 }
  0x2c   :  { %416 = vmatmul.mubr.bf16.gmra.mrb[4].mxu1 %v576_v39 }
  0xf6   :  { %v493_v40 = vpop.f32.mrb[0].mxu0 }
  0xf7   :  { %v521_v41 = vpop.f32.mrb[0].mxu1  ;;  %v494_v43 = vpop.f32.mrb[1].mxu0 }
  0xf8   :  { %v495_v44 = vadd.f32 %v494_v43, %v493_v40  ;;  %v522_v45 = vpop.f32.mrb[1].mxu1  ;;  %v496_v46 = vpop.f32.mrb[2].mxu0 }
  0xf9   :  { %v523_v47 = vadd.f32 %v522_v45, %v521_v41  ;;  %v524_v48 = vpop.f32.mrb[2].mxu1  ;;  %v497_v49 = vpop.f32.mrb[3].mxu0 }
  0xfa   :  { %v361_v50 = vadd.f32 %v495_v44, %v436_v42  ;;  %v498_v51 = vadd.f32 %v497_v49, %v496_v46  ;;  %v525_v52 = vpop.f32.mrb[3].mxu1 }
  0xfb   :  { %v526_v53 = vadd.f32 %v525_v52, %v524_v48 }
  0xfc   :  { %v410_v54 = vadd.f32 %v523_v47, %v361_v50  ;;  %v364_v55 = vadd.f32 %v498_v51, %v436_v42 }
  0xfe   :  { %v424_v56 = vmax.f32 %v410_v54, 0.0  ;;  %v413_v57 = vadd.f32 %v526_v53, %v364_v55  ;;  %v499_v58 = vpop.f32.mrb[4].mxu0 }
  0xff   :  { %v527_v59 = vpop.f32.mrb[4].mxu1  ;;  %v500_v60 = vpop.f32.mrb[5].mxu0 }
 0x100   :  { %428 = vst [vmem:[%s735_s3] sm:$0xff] %v424_v56  ;;  %v425_v61 = vmax.f32 %v413_v57, 0.0  ;;  %v501_v62 = vadd.f32 %v500_v60, %v499_v58  ;;  %v528_v63 = vpop.f32.mrb[5].mxu1  ;;  %v502_v0 = vpop.f32.mrb[6].mxu0 }
 0x101   :  { %v529_v1 = vadd.f32 %v528_v63, %v527_v59  ;;  %v530_v2 = vpop.f32.mrb[6].mxu1  ;;  %v503_v3 = vpop.f32.mrb[7].mxu0 }
 0x102   :  { %429 = vst [vmem:[%s735_s3 + $0x8] sm:$0xff] %v425_v61  ;;  %v369_v4 = vadd.f32 %v501_v62, %v436_v42  ;;  %v504_v5 = vadd.f32 %v503_v3, %v502_v0  ;;  %v531_v6 = vpop.f32.mrb[7].mxu1 }
 0x103   :  { %v532_v7 = vadd.f32 %v531_v6, %v530_v2 }
 0x104   :  { %v418_v8 = vadd.f32 %v529_v1, %v369_v4  ;;  %v372_v9 = vadd.f32 %v504_v5, %v436_v42 }
 0x106   :  { %v426_v10 = vmax.f32 %v418_v8, 0.0  ;;  %v421_v11 = vadd.f32 %v532_v7, %v372_v9 }
 0x108   :  { %430 = vst [vmem:[%s735_s3 + $0x10] sm:$0xff] %v426_v10  ;;  %v427_v12 = vmax.f32 %v421_v11, 0.0 }
 0x10a   :  { %431 = vst [vmem:[%s735_s3 + $0x18] sm:$0xff] %v427_v12 }

// kernel: tile.13
= control target key start
LH: loop header
LB: loop body
LE: loop exit
PB: predicated region body
PF: predicated region fallthrough
CT: control target
= control target key end

     0   :  { %s200_s0 = inlined_call_operand.vmem [shape: f32[512,3,6], index: 0, kind: input, shape index: {}]   ;;  %s201_s1 = inlined_call_operand.vmem [shape: f32[512,18], index: 1, kind: output, shape index: {}]  }
   0x1   :  { %v2_v0 = vld [vmem:[%s200_s0] sm:$0x3f]   ;;  %v64_v1 = vld [vmem:[%s200_s0 + $0x8] sm:$0x3f]   ;;  %v66_v2 = vld [vmem:[%s200_s0 + $0x10] sm:$0x3f]  }
   0x2   :  { %3 = vst [vmem:[%s201_s1] sm:$0x3f] %v2_v0   ;;  %65 = vst [vmem:[%s201_s1 + $0x8] sm:$0x3f] %v64_v1   ;;  %v68_v3 = vld [vmem:[%s200_s0 + $0x18] sm:$0x3f]  }
   0x3   :  { %67 = vst [vmem:[%s201_s1 + $0x10] sm:$0x3f] %v66_v2   ;;  %v70_v4 = vld [vmem:[%s200_s0 + $0x20] sm:$0x3f]   ;;  %v73_v5 = vld [vmem:[%s200_s0 + $0x28] sm:$0x3f]  }
   0x4   :  { %69 = vst [vmem:[%s201_s1 + $0x18] sm:$0x3f] %v68_v3   ;;  %71 = vst [vmem:[%s201_s1 + $0x6] sm:$0x3] %v70_v4   ;;  %v76_v6 = vld [vmem:[%s200_s0 + $0x30] sm:$0x3f]  }
   0x5   :  { %72 = vst [vmem:[%s201_s1 + $0x1e] sm:$0x3c] %v70_v4   ;;  %74 = vst [vmem:[%s201_s1 + $0xe] sm:$0x3] %v73_v5   ;;  %v79_v7 = vld [vmem:[%s200_s0 + $0x38] sm:$0x3f]  }
   0x6   :  { %75 = vst [vmem:[%s201_s1 + $0x26] sm:$0x3c] %v73_v5   ;;  %v82_v8 = vld [vmem:[%s200_s0 + $0x40] sm:$0x3f]   ;;  %77 = vst [vmem:[%s201_s1 + $0x16] sm:$0x3] %v76_v6  }
   0x7   :  { %78 = vst [vmem:[%s201_s1 + $0x2e] sm:$0x3c] %v76_v6   ;;  %80 = vst [vmem:[%s201_s1 + $0x1e] sm:$0x3] %v79_v7   ;;  %v85_v9 = vld [vmem:[%s200_s0 + $0x48] sm:$0x3f]  }
   0x8   :  { %81 = vst [vmem:[%s201_s1 + $0x36] sm:$0x3c] %v79_v7   ;;  %83 = vst [vmem:[%s201_s1 + $0x24] sm:$0xf] %v82_v8   ;;  %v88_v10 = vld [vmem:[%s200_s0 + $0x50] sm:$0x3f]  }
   0x9   :  { %84 = vst [vmem:[%s201_s1 + $0x3c] sm:$0x30] %v82_v8   ;;  %v91_v11 = vld [vmem:[%s200_s0 + $0x58] sm:$0x3f]   ;;  %86 = vst [vmem:[%s201_s1 + $0x2c] sm:$0xf] %v85_v9  }
   0xa   :  { %87 = vst [vmem:[%s201_s1 + $0x44] sm:$0x30] %v85_v9   ;;  %89 = vst [vmem:[%s201_s1 + $0x34] sm:$0xf] %v88_v10  }
   0xb   :  { %90 = vst [vmem:[%s201_s1 + $0x4c] sm:$0x30] %v88_v10   ;;  %92 = vst [vmem:[%s201_s1 + $0x3c] sm:$0xf] %v91_v11  }
   0xc   :  { %93 = vst [vmem:[%s201_s1 + $0x54] sm:$0x30] %v91_v11  }

// kernel: hyper_dqn_forward.6
= control target key start
LH: loop header
LB: loop body
LE: loop exit
PB: predicated region body
PF: predicated region fallthrough
CT: control target
= control target key end

     0   :  { %v607_v35 = vmov 0.0   ;;  %vm608_vm0 = vmmov 0   ;;  %vm330_vm1 = vcmask 523264   ;;  %s752_s1 = inlined_call_operand.vmem [shape: bf16[576,128], index: 1, kind: input, shape index: {}]   ;;  %s753_s0 = inlined_call_operand.vmem [shape: bf16[8,576], index: 0, kind: input, shape index: {}]   ;;  %s754_s2 = inlined_call_operand.vmem [shape: f32[1,128], index: 2, kind: input, shape index: {}]   ;;  %s755_s3 = inlined_call_operand.vmem [shape: f32[8,128], index: 3, kind: output, shape index: {}]  }
   0x1   :  { %v566_v0 = vld [vmem:[%s752_s1 + $0x40] sm:$0xff]   ;;  %v570_v4 = vld [vmem:[%s752_s1 + $0x48] sm:$0xff]   ;;  %v574_v8 = vld [vmem:[%s752_s1 + $0x50] sm:$0xff]  }
   0x2   :  { %v567_v1 = vld [vmem:[%s752_s1] sm:$0xff]   ;;  %503 = vmatprep.subr.bf16.mxu0 %v566_v0  ;;  %v571_v5 = vld [vmem:[%s752_s1 + $0x8] sm:$0xff]   ;;  %v575_v9 = vld [vmem:[%s752_s1 + $0x10] sm:$0xff]  }
   0x3   :  { %v568_v2 = vld [vmem:[%s752_s1 + $0xc0] sm:$0xff]   ;;  %504 = vmatpush3.bf16.msra.mxu0 %v567_v1  ;;  %v572_v6 = vld [vmem:[%s752_s1 + $0xc8] sm:$0xff]   ;;  %v576_v10 = vld [vmem:[%s752_s1 + $0xd0] sm:$0xff]  }
   0x4   :  { %v569_v3 = vld [vmem:[%s752_s1 + $0x80] sm:$0xff]   ;;  %525 = vmatprep.subr.bf16.mxu1 %v568_v2  ;;  %505 = vmatprep.subr.bf16.mxu0 %v570_v4  ;;  %v573_v7 = vld [vmem:[%s752_s1 + $0x88] sm:$0xff]   ;;  %v577_v11 = vld [vmem:[%s752_s1 + $0x90] sm:$0xff]  }
   0x5   :  { %526 = vmatpush3.bf16.msra.mxu1 %v569_v3  ;;  %v578_v12 = vld [vmem:[%s752_s1 + $0x58] sm:$0xff]   ;;  %v582_v16 = vld [vmem:[%s752_s1 + $0x60] sm:$0xff]   ;;  %v586_v20 = vld [vmem:[%s752_s1 + $0x68] sm:$0xff]  }
   0x6   :  { %527 = vmatprep.subr.bf16.mxu1 %v572_v6  ;;  %v579_v13 = vld [vmem:[%s752_s1 + $0x18] sm:$0xff]   ;;  %v583_v17 = vld [vmem:[%s752_s1 + $0x20] sm:$0xff]   ;;  %v587_v21 = vld [vmem:[%s752_s1 + $0x28] sm:$0xff]  }
   0x7   :  { %506 = vmatpush3.bf16.msra.mxu0 %v571_v5  ;;  %v580_v14 = vld [vmem:[%s752_s1 + $0xd8] sm:$0xff]   ;;  %v584_v18 = vld [vmem:[%s752_s1 + $0xe0] sm:$0xff]   ;;  %v588_v22 = vld [vmem:[%s752_s1 + $0xe8] sm:$0xff]  }
   0x8   :  { %507 = vmatprep.subr.bf16.mxu0 %v574_v8  ;;  %v581_v15 = vld [vmem:[%s752_s1 + $0x98] sm:$0xff]   ;;  %v585_v19 = vld [vmem:[%s752_s1 + $0xa0] sm:$0xff]   ;;  %v589_v23 = vld [vmem:[%s752_s1 + $0xa8] sm:$0xff]  }
   0x9   :  { %528 = vmatpush3.bf16.msra.mxu1 %v573_v7  ;;  %v590_v24 = vld [vmem:[%s752_s1 + $0x70] sm:$0xff]   ;;  %v594_v28 = vld [vmem:[%s752_s1 + $0x78] sm:$0xff]   ;;  %v15_v31 = vld [vmem:[%s753_s0] sm:$0xff] }
   0xa   :  { %529 = vmatprep.subr.bf16.mxu1 %v576_v10  ;;  %v591_v25 = vld [vmem:[%s752_s1 + $0x30] sm:$0xff]   ;;  %v595_v29 = vld [vmem:[%s752_s1 + $0x38] sm:$0xff]   ;;  %v461_v32 = vcombine.low %v15_v31, %v15_v31  ;;  %v462_v33 = vcombine.high %v15_v31, %v15_v31  ;;  %v16_v36 = vld [vmem:[%s753_s0 + $0x8] sm:$0xff] }
   0xb   :  { %508 = vmatpush3.bf16.msra.mxu0 %v575_v9  ;;  %v592_v26 = vld [vmem:[%s752_s1 + $0xf0] sm:$0xff]   ;;  %v596_v30 = vld [vmem:[%s752_s1 + $0xf8] sm:$0xff]   ;;  %v463_v37 = vcombine.low %v16_v36, %v16_v36  ;;  %v464_v38 = vcombine.high %v16_v36, %v16_v36  ;;  %v603_v39 = vld [vmem:[%s752_s1 + $0x100] sm:$0xff]  }
   0xc   :  { %509 = vmatprep.subr.bf16.mxu0 %v578_v12  ;;  %v593_v27 = vld [vmem:[%s752_s1 + $0xb0] sm:$0xff]   ;;  %v600_v34 = vld [vmem:[%s752_s1 + $0xb8] sm:$0xff]   ;;  %366 = vmatprep.mubr.bf16.mxu0 %v462_v33  ;;  %v604_v40 = vld [vmem:[%s752_s1 + $0x108] sm:$0xff]  }
   0xd   :  { %530 = vmatpush3.bf16.msra.mxu1 %v577_v11  ;;  %406 = vmatprep.mubr.bf16.mxu1 %v464_v38  ;;  %v605_v41 = vld [vmem:[%s752_s1 + $0x110] sm:$0xff]   ;;  %v606_v42 = vld [vmem:[%s752_s1 + $0x118] sm:$0xff]   ;;  %v460_v45 = vld [vmem:[%s754_s2] ss:$0 sm:$0xff] }
   0xe   :  { %531 = vmatprep.subr.bf16.mxu1 %v580_v14  ;;  %v599_v43 = vld [vmem:[%s753_s0 + $0x10] ss:$0 sps:$4 sm:$0xff]  }
   0xf   :  { %510 = vmatpush3.bf16.msra.mxu0 %v579_v13 }
  0x10   :  { %511 = vmatprep.subr.bf16.mxu0 %v582_v16 }
  0x11   :  { %532 = vmatpush3.bf16.msra.mxu1 %v581_v15 }
  0x12   :  { %533 = vmatprep.subr.bf16.mxu1 %v584_v18 }
  0x13   :  { %512 = vmatpush3.bf16.msra.mxu0 %v583_v17 }
  0x14   :  { %513 = vmatprep.subr.bf16.mxu0 %v586_v20 }
  0x15   :  { %534 = vmatpush3.bf16.msra.mxu1 %v585_v19 }
  0x16   :  { %535 = vmatprep.subr.bf16.mxu1 %v588_v22 }
  0x17   :  { %514 = vmatpush3.bf16.msra.mxu0 %v587_v21 }
  0x18   :  { %515 = vmatprep.subr.bf16.mxu0 %v590_v24 }
  0x19   :  { %536 = vmatpush3.bf16.msra.mxu1 %v589_v23 }
  0x1a   :  { %537 = vmatprep.subr.bf16.mxu1 %v592_v26 }
  0x1b   :  { %516 = vmatpush3.bf16.msra.mxu0 %v591_v25 }
  0x1c   :  { %517 = vmatprep.subr.bf16.mxu0 %v594_v28 }
  0x1d   :  { %538 = vmatpush3.bf16.msra.mxu1 %v593_v27 }
  0x1e   :  { %539 = vmatprep.subr.bf16.mxu1 %v596_v30 }
  0x1f   :  { %518 = vmatpush3.bf16.msra.mxu0 %v595_v29 }
  0x20   :  { %552 = vmatprep.subr.bf16.mxu0 %v607_v35 }
  0x21   :  { %540 = vmatpush3.bf16.msra.mxu1 %v600_v34 }
  0x22   :  { %367 = vmatmul.mubr.bf16.vlgmr.msra.gmra.mrb[0].mxu0 %v461_v32 }
  0x23   :  { %553 = vmatpush3.bf16.msra.mxu0 %v603_v39  ;;  %560 = vmatprep.mubr.msk.bf16.mxu0 %vm608_vm0, %v607_v35 }
  0x24   :  { %407 = vmatmul.mubr.bf16.vlgmr.msra.gmra.mrb[0].mxu1 %v463_v37  ;;  %554 = vmatprep.subr.bf16.mxu0 %v607_v35 }
  0x27   :  { %555 = vmatpush3.bf16.msra.mxu0 %v604_v40 }
  0x28   :  { %556 = vmatprep.subr.bf16.mxu0 %v607_v35 }
  0x2b   :  { %557 = vmatpush3.bf16.msra.mxu0 %v605_v41 }
  0x2c   :  { %558 = vmatprep.subr.bf16.mxu0 %v607_v35 }
  0x2f   :  { %559 = vmatpush3.bf16.msra.mxu0 %v606_v42 }
  0x32   :  { %561 = vmatmul.mubr.msk.bf16.vlgmr.msra.gmra.mrb[4].mxu0 %vm330_vm1, %v599_v43 }
  0xf5   :  { %v519_v44 = vpop.f32.mrb[0].mxu0 }
  0xf6   :  { %v520_v46 = vpop.f32.mrb[1].mxu0 }
  0xf7   :  { %v521_v47 = vadd.f32 %v520_v46, %v519_v44  ;;  %v522_v48 = vpop.f32.mrb[2].mxu0  ;;  %v541_v49 = vpop.f32.mrb[0].mxu1 }
  0xf8   :  { %v523_v50 = vpop.f32.mrb[3].mxu0  ;;  %v542_v51 = vpop.f32.mrb[1].mxu1 }
  0xf9   :  { %v369_v52 = vadd.f32 %v521_v47, %v460_v45  ;;  %v543_v53 = vadd.f32 %v542_v51, %v541_v49  ;;  %v544_v54 = vpop.f32.mrb[2].mxu1 }
  0xfa   :  { %v545_v55 = vpop.f32.mrb[3].mxu1 }
  0xfb   :  { %v409_v56 = vadd.f32 %v543_v53, %v369_v52 }
 0x105   :  { %v448_v57 = vpop.f32.mrb[4].mxu0 }
 0x106   :  { %v449_v58 = vadd.f32 %v448_v57, %v409_v56  ;;  %v562_v59 = vpop.f32.mrb[5].mxu0 }
 0x107   :  { %v451_v60 = vpop.f32.mrb[6].mxu0 }
 0x108   :  { %v454_v61 = vmax.f32 %v449_v58, 0.0  ;;  %v563_v62 = vpop.f32.mrb[7].mxu0 }
 0x10a   :  { %455 = vst [vmem:[%s755_s3] sm:$0xff] %v454_v61 }

// kernel: hyper_dqn_forward.7
= control target key start
LH: loop header
LB: loop body
LE: loop exit
PB: predicated region body
PF: predicated region fallthrough
CT: control target
= control target key end

     0   :  { %v96_v9 = vlaneseq  ;;  %v2075_v10 = vmov 1966171168   ;;  %vm681_vm0 = vcmask 392192   ;;  %vm2077_vm1 = vmmov 0   ;;  %s3002_s1 = inlined_call_operand.vmem [shape: bf16[256,512], index: 1, kind: input, shape index: {}]   ;;  %s3003_s0 = inlined_call_operand.vmem [shape: bf16[2,256], index: 0, kind: input, shape index: {}]   ;;  %s3004_s5 = inlined_call_operand.vmem [shape: f32[48,18], index: 5, kind: input, shape index: {}]   ;;  %s3005_s3 = inlined_call_operand.vmem [shape: f32[512,48], index: 3, kind: input, shape index: {}]   ;;  %s3006_s6 = inlined_call_operand.vmem [shape: f32[1,48], index: 6, kind: input, shape index: {}]   ;;  %s3007_s2 = inlined_call_operand.vmem [shape: f32[1,512], index: 2, kind: input, shape index: {}]   ;;  %s3008_s4 = inlined_call_operand.vmem [shape: f32[512,18], index: 4, kind: input, shape index: {}]   ;;  %s3009_s7 = inlined_call_operand.vmem [shape: f32[1,18], index: 7, kind: input, shape index: {}]   ;;  %s3010_s8 = inlined_call_operand.vmem [shape: f32[2,18], index: 8, kind: output, shape index: {}]  }
   0x1   :  { %v1979_v0 = vld [vmem:[%s3002_s1 + $0x4] ss:$16 sps:$4 sm:$0xff]   ;;  %v1981_v1 = vld [vmem:[%s3002_s1] ss:$16 sps:$4 sm:$0xff]   ;;  %v126_v11 = vunpack.c.l.s4 %v2075_v10  ;;  %v2027_v26 = vld [vmem:[%s3002_s1 + $0xc] ss:$16 sps:$4 sm:$0xff]  }
   0x2   :  { %461 = vmatprep.subr.bf16.mxu0 %v1979_v0  ;;  %v1982_v2 = vld [vmem:[%s3002_s1 + $0x24] ss:$16 sps:$4 sm:$0xff]   ;;  %v1984_v3 = vld [vmem:[%s3002_s1 + $0x20] ss:$16 sps:$4 sm:$0xff]   ;;  %v2157_v14 = vshrl.u32 %v96_v9, 7  ;;  %502 = vmatprep.subr.bf16.mxu1 %v2027_v26  ;;  %v612_v58 = vld [vmem:[%s3004_s5 + $0x8] sm:$0xff] }
   0x3   :  { %462 = vmatpush1.bf16.msra.mxu0 %v1981_v1  ;;  %v1985_v4 = vld [vmem:[%s3002_s1 + $0x44] ss:$16 sps:$4 sm:$0xff]   ;;  %v1987_v5 = vld [vmem:[%s3002_s1 + $0x40] ss:$16 sps:$4 sm:$0xff]   ;;  %v127_v15 = vunpack.c.0.s8 %v126_v11  ;;  %v2029_v27 = vld [vmem:[%s3002_s1 + $0x8] ss:$16 sps:$4 sm:$0xff]  }
   0x4   :  { %463 = vmatprep.subr.bf16.mxu0 %v1982_v2  ;;  %v1988_v6 = vld [vmem:[%s3002_s1 + $0x64] ss:$16 sps:$4 sm:$0xff]   ;;  %v1990_v7 = vld [vmem:[%s3002_s1 + $0x60] ss:$16 sps:$4 sm:$0xff]   ;;  %v2030_v28 = vld [vmem:[%s3002_s1 + $0x2c] ss:$16 sps:$4 sm:$0xff]   ;;  %503 = vmatpush1.bf16.msra.mxu1 %v2029_v27 }
   0x5   :  { %v1991_v8 = vld [vmem:[%s3002_s1 + $0x84] ss:$16 sps:$4 sm:$0xff]   ;;  %v1993_v12 = vld [vmem:[%s3002_s1 + $0x80] ss:$16 sps:$4 sm:$0xff]   ;;  %v2166_v18 = vsub.s32 %v127_v15, %v2157_v14  ;;  %v2032_v31 = vld [vmem:[%s3002_s1 + $0x28] ss:$16 sps:$4 sm:$0xff]   ;;  %504 = vmatprep.subr.bf16.mxu1 %v2030_v28 }
   0x6   :  { %v1994_v13 = vld [vmem:[%s3002_s1 + $0xa4] ss:$16 sps:$4 sm:$0xff]   ;;  %v1996_v16 = vld [vmem:[%s3002_s1 + $0xa0] ss:$16 sps:$4 sm:$0xff]   ;;  %v2033_v32 = vld [vmem:[%s3002_s1 + $0x4c] ss:$16 sps:$4 sm:$0xff]  }
   0x7   :  { %464 = vmatpush1.bf16.msra.mxu0 %v1984_v3  ;;  %v1997_v17 = vld [vmem:[%s3002_s1 + $0xc4] ss:$16 sps:$4 sm:$0xff]   ;;  %v2171_v19 = vld.sshfl [vmem:[%s3003_s0] sm:$0x11 pattern:$0x75316420] }
   0x8   :  { %465 = vmatprep.subr.bf16.mxu0 %v1985_v4  ;;  %v124_v20 = vcombine.high %v2171_v19, %v2171_v19  ;;  %v1999_v21 = vld [vmem:[%s3002_s1 + $0xc0] ss:$16 sps:$4 sm:$0xff]   ;;  %v2000_v22 = vld [vmem:[%s3002_s1 + $0xe4] ss:$16 sps:$4 sm:$0xff]   ;;  %505 = vmatpush1.bf16.msra.mxu1 %v2032_v31  ;;  %v2035_v35 = vld [vmem:[%s3002_s1 + $0x48] ss:$16 sps:$4 sm:$0xff]   ;;  %v2306_v1 = vrot.slane %v2171_v19, %v2166_v18 }
   0x9   :  { %v2002_v24 = vld [vmem:[%s3002_s1 + $0xe0] ss:$16 sps:$4 sm:$0xff]   ;;  %v2003_v25 = vld [vmem:[%s3002_s1 + $0x104] ss:$16 sps:$4 sm:$0xff]   ;;  %506 = vmatprep.subr.bf16.mxu1 %v2033_v32  ;;  %v2036_v36 = vld [vmem:[%s3002_s1 + $0x6c] ss:$16 sps:$4 sm:$0xff]  }
   0xa   :  { %v138_v23 = vrot.slane %v124_v20, %v2166_v18  ;;  %v2005_v29 = vld [vmem:[%s3002_s1 + $0x100] ss:$16 sps:$4 sm:$0xff]   ;;  %v2006_v30 = vld [vmem:[%s3002_s1 + $0x124] ss:$16 sps:$4 sm:$0xff]   ;;  %v2038_v39 = vld [vmem:[%s3002_s1 + $0x68] ss:$16 sps:$4 sm:$0xff]  }
   0xb   :  { %466 = vmatpush1.bf16.msra.mxu0 %v1987_v5  ;;  %v2008_v33 = vld [vmem:[%s3002_s1 + $0x120] ss:$16 sps:$4 sm:$0xff]   ;;  %v2009_v34 = vld [vmem:[%s3002_s1 + $0x144] ss:$16 sps:$4 sm:$0xff]   ;;  %v2039_v40 = vld [vmem:[%s3002_s1 + $0x8c] ss:$16 sps:$4 sm:$0xff]  }
   0xc   :  { %467 = vmatprep.subr.bf16.mxu0 %v1988_v6  ;;  %493 = vmatprep.mubr.bf16.mxu0 %v138_v23  ;;  %v2011_v37 = vld [vmem:[%s3002_s1 + $0x140] ss:$16 sps:$4 sm:$0xff]   ;;  %v2012_v38 = vld [vmem:[%s3002_s1 + $0x164] ss:$16 sps:$4 sm:$0xff]   ;;  %v2041_v43 = vld [vmem:[%s3002_s1 + $0x88] ss:$16 sps:$4 sm:$0xff]  }
   0xd   :  { %534 = vmatprep.mubr.bf16.mxu1 %v138_v23  ;;  %507 = vmatpush1.bf16.msra.mxu1 %v2035_v35  ;;  %v2014_v41 = vld [vmem:[%s3002_s1 + $0x160] ss:$16 sps:$4 sm:$0xff]   ;;  %v2015_v42 = vld [vmem:[%s3002_s1 + $0x184] ss:$16 sps:$4 sm:$0xff]   ;;  %v2042_v44 = vld [vmem:[%s3002_s1 + $0xac] ss:$16 sps:$4 sm:$0xff]  }
   0xe   :  { %508 = vmatprep.subr.bf16.mxu1 %v2036_v36  ;;  %v2017_v45 = vld [vmem:[%s3002_s1 + $0x180] ss:$16 sps:$4 sm:$0xff]   ;;  %v2018_v46 = vld [vmem:[%s3002_s1 + $0x1a4] ss:$16 sps:$4 sm:$0xff]   ;;  %v2044_v47 = vld [vmem:[%s3002_s1 + $0xa8] ss:$16 sps:$4 sm:$0xff]  }
   0xf   :  { %468 = vmatpush1.bf16.msra.mxu0 %v1990_v7  ;;  %v2045_v48 = vld [vmem:[%s3002_s1 + $0xcc] ss:$16 sps:$4 sm:$0xff]   ;;  %v2020_v49 = vld [vmem:[%s3002_s1 + $0x1a0] ss:$16 sps:$4 sm:$0xff]   ;;  %v2021_v50 = vld [vmem:[%s3002_s1 + $0x1c4] ss:$16 sps:$4 sm:$0xff]  }
  0x10   :  { %469 = vmatprep.subr.bf16.mxu0 %v1991_v8  ;;  %v2047_v51 = vld [vmem:[%s3002_s1 + $0xc8] ss:$16 sps:$4 sm:$0xff]   ;;  %v2048_v52 = vld [vmem:[%s3002_s1 + $0xec] ss:$16 sps:$4 sm:$0xff]   ;;  %v2023_v53 = vld [vmem:[%s3002_s1 + $0x1c0] ss:$16 sps:$4 sm:$0xff]  }
  0x11   :  { %509 = vmatpush1.bf16.msra.mxu1 %v2038_v39  ;;  %v2024_v54 = vld [vmem:[%s3002_s1 + $0x1e4] ss:$16 sps:$4 sm:$0xff]   ;;  %v2050_v55 = vld [vmem:[%s3002_s1 + $0xe8] ss:$16 sps:$4 sm:$0xff]   ;;  %v2051_v56 = vld [vmem:[%s3002_s1 + $0x10c] ss:$16 sps:$4 sm:$0xff]  }
  0x12   :  { %510 = vmatprep.subr.bf16.mxu1 %v2039_v40  ;;  %v611_v57 = vld [vmem:[%s3004_s5] sm:$0xff]  ;;  %v2053_v60 = vld [vmem:[%s3002_s1 + $0x108] ss:$16 sps:$4 sm:$0xff]   ;;  %v2054_v62 = vld [vmem:[%s3002_s1 + $0x12c] ss:$16 sps:$4 sm:$0xff]   ;;  %v2076_v40 = vmov 0.0|0.0  }
  0x13   :  { %470 = vmatpush1.bf16.msra.mxu0 %v1993_v12  ;;  %v2026_v59 = vld [vmem:[%s3002_s1 + $0x1e0] ss:$16 sps:$4 sm:$0xff]   ;;  %v2293_v61 = vpack.c.bf16 %v612_v58, %v611_v57  ;;  %v614_v0 = vld [vmem:[%s3004_s5 + $0x18] sm:$0xff]  ;;  %v616_v6 = vld [vmem:[%s3004_s5 + $0x28] sm:$0xff]  ;;  %vm1478_vm2 = vcmask 140288  }
  0x14   :  { %471 = vmatprep.subr.bf16.mxu0 %v1994_v13  ;;  %v613_v63 = vld [vmem:[%s3004_s5 + $0x10] sm:$0xff]  ;;  %v547_v3 = vld [vmem:[%s3005_s3] sm:$0xff]  ;;  %v2056_v4 = vld [vmem:[%s3002_s1 + $0x128] ss:$16 sps:$4 sm:$0xff]  }
  0x15   :  { %511 = vmatpush1.bf16.msra.mxu1 %v2041_v43  ;;  %v2309_v2 = vpack.c.bf16 %v614_v0, %v613_v63  ;;  %v615_v5 = vld [vmem:[%s3004_s5 + $0x20] sm:$0xff]  ;;  %v2057_v7 = vld [vmem:[%s3002_s1 + $0x14c] ss:$16 sps:$4 sm:$0xff]   ;;  %v2059_v9 = vld [vmem:[%s3002_s1 + $0x148] ss:$16 sps:$4 sm:$0xff]  }
  0x16   :  { %512 = vmatprep.subr.bf16.mxu1 %v2042_v44  ;;  %v2330_v8 = vpack.c.bf16 %v616_v6, %v615_v5  ;;  %v2060_v10 = vld [vmem:[%s3002_s1 + $0x16c] ss:$16 sps:$4 sm:$0xff]   ;;  %v2062_v11 = vld [vmem:[%s3002_s1 + $0x168] ss:$16 sps:$4 sm:$0xff]   ;;  %v549_v15 = vld [vmem:[%s3005_s3 + $0x10] sm:$0xff] }
  0x17   :  { %472 = vmatpush1.bf16.msra.mxu0 %v1996_v16  ;;  %v2063_v12 = vld [vmem:[%s3002_s1 + $0x18c] ss:$16 sps:$4 sm:$0xff]   ;;  %v2065_v16 = vld [vmem:[%s3002_s1 + $0x188] ss:$16 sps:$4 sm:$0xff]   ;;  %v551_v19 = vld [vmem:[%s3005_s3 + $0x20] sm:$0xff] }
  0x18   :  { %473 = vmatprep.subr.bf16.mxu0 %v1997_v17  ;;  %v548_v13 = vld [vmem:[%s3005_s3 + $0x8] sm:$0xff]  ;;  %v550_v18 = vld [vmem:[%s3005_s3 + $0x18] sm:$0xff]  ;;  %v553_v23 = vld [vmem:[%s3005_s3 + $0x30] sm:$0xff] }
  0x19   :  { %513 = vmatpush1.bf16.msra.mxu1 %v2044_v47  ;;  %v2066_v17 = vld [vmem:[%s3002_s1 + $0x1ac] ss:$16 sps:$4 sm:$0xff]   ;;  %v2068_v20 = vld [vmem:[%s3002_s1 + $0x1a8] ss:$16 sps:$4 sm:$0xff]   ;;  %v555_v27 = vld [vmem:[%s3005_s3 + $0x40] sm:$0xff] }
  0x1a   :  { %514 = vmatprep.subr.bf16.mxu1 %v2045_v48  ;;  %v554_v26 = vld [vmem:[%s3005_s3 + $0x38] sm:$0xff]  ;;  %v597_v31 = vld [vmem:[%s3005_s3 + $0x190] sm:$0xff]  ;;  %v599_v39 = vld [vmem:[%s3005_s3 + $0x1a0] sm:$0xff] }
  0x1b   :  { %474 = vmatpush1.bf16.msra.mxu0 %v1999_v21  ;;  %v2069_v21 = vld [vmem:[%s3002_s1 + $0x1cc] ss:$16 sps:$4 sm:$0xff]   ;;  %v2074_v28 = vld [vmem:[%s3002_s1 + $0x1e8] ss:$16 sps:$4 sm:$0xff]   ;;  %v561_v35 = vld [vmem:[%s3005_s3 + $0x70] sm:$0xff] }
  0x1c   :  { %475 = vmatprep.subr.bf16.mxu0 %v2000_v22  ;;  %v552_v22 = vld [vmem:[%s3005_s3 + $0x28] sm:$0xff]  ;;  %v558_v32 = vld [vmem:[%s3005_s3 + $0x58] sm:$0xff]  ;;  %v601_v44 = vld [vmem:[%s3005_s3 + $0x1b0] sm:$0xff] }
  0x1d   :  { %515 = vmatpush1.bf16.msra.mxu1 %v2047_v51  ;;  %v562_v36 = vld [vmem:[%s3005_s3 + $0x78] sm:$0xff]  ;;  %v600_v43 = vld [vmem:[%s3005_s3 + $0x1a8] sm:$0xff]  ;;  %v603_v48 = vld [vmem:[%s3005_s3 + $0x1c0] sm:$0xff] }
  0x1e   :  { %516 = vmatprep.subr.bf16.mxu1 %v2048_v52  ;;  %v602_v47 = vld [vmem:[%s3005_s3 + $0x1b8] sm:$0xff]  ;;  %v604_v51 = vld [vmem:[%s3005_s3 + $0x1c8] sm:$0xff]  ;;  %v605_v52 = vld [vmem:[%s3005_s3 + $0x1d0] sm:$0xff] }
  0x1f   :  { %476 = vmatpush1.bf16.msra.mxu0 %v2002_v24  ;;  %v2071_v24 = vld [vmem:[%s3002_s1 + $0x1c8] ss:$16 sps:$4 sm:$0xff]   ;;  %v573_v58 = vld [vmem:[%s3005_s3 + $0xd0] sm:$0xff] }
  0x20   :  { %477 = vmatprep.subr.bf16.mxu0 %v2003_v25  ;;  %v2072_v25 = vld [vmem:[%s3002_s1 + $0x1ec] ss:$16 sps:$4 sm:$0xff]   ;;  %v581_v5 = vld [vmem:[%s3005_s3 + $0x110] sm:$0xff] }
  0x21   :  { %517 = vmatpush1.bf16.msra.mxu1 %v2050_v55  ;;  %v606_v55 = vld [vmem:[%s3005_s3 + $0x1d8] sm:$0xff]  ;;  %v572_v57 = vld [vmem:[%s3005_s3 + $0xc8] sm:$0xff] }
  0x22   :  { %518 = vmatprep.subr.bf16.mxu1 %v2051_v56  ;;  %v607_v56 = vld [vmem:[%s3005_s3 + $0x1e0] sm:$0xff]  ;;  %v610_v63 = vld [vmem:[%s3005_s3 + $0x1f8] sm:$0xff]  ;;  %v576_v0 = vld [vmem:[%s3005_s3 + $0xe8] sm:$0xff] }
  0x23   :  { %478 = vmatpush1.bf16.msra.mxu0 %v2005_v29  ;;  %v556_v29 = vld [vmem:[%s3005_s3 + $0x48] sm:$0xff]  ;;  %v582_v6 = vld [vmem:[%s3005_s3 + $0x118] sm:$0xff] }
  0x24   :  { %479 = vmatprep.subr.bf16.mxu0 %v2006_v30  ;;  %v557_v30 = vld [vmem:[%s3005_s3 + $0x50] sm:$0xff] }
  0x25   :  { %519 = vmatpush1.bf16.msra.mxu1 %v2053_v60  ;;  %v609_v60 = vld [vmem:[%s3005_s3 + $0x1f0] sm:$0xff] }
  0x26   :  { %520 = vmatprep.subr.bf16.mxu1 %v2054_v62  ;;  %v575_v62 = vld [vmem:[%s3005_s3 + $0xe0] sm:$0xff] }
  0x27   :  { %480 = vmatpush1.bf16.msra.mxu0 %v2008_v33  ;;  %v559_v33 = vld [vmem:[%s3005_s3 + $0x60] sm:$0xff] }
  0x28   :  { %481 = vmatprep.subr.bf16.mxu0 %v2009_v34  ;;  %v560_v34 = vld [vmem:[%s3005_s3 + $0x68] sm:$0xff] }
  0x29   :  { %521 = vmatpush1.bf16.msra.mxu1 %v2056_v4  ;;  %v580_v4 = vld [vmem:[%s3005_s3 + $0x108] sm:$0xff] }
  0x2a   :  { %522 = vmatprep.subr.bf16.mxu1 %v2057_v7  ;;  %v583_v7 = vld [vmem:[%s3005_s3 + $0x120] sm:$0xff] }
  0x2b   :  { %482 = vmatpush1.bf16.msra.mxu0 %v2011_v37  ;;  %v563_v37 = vld [vmem:[%s3005_s3 + $0x80] sm:$0xff] }
  0x2c   :  { %483 = vmatprep.subr.bf16.mxu0 %v2012_v38  ;;  %v598_v38 = vld [vmem:[%s3005_s3 + $0x198] sm:$0xff] }
  0x2d   :  { %523 = vmatpush1.bf16.msra.mxu1 %v2059_v9  ;;  %v585_v9 = vld [vmem:[%s3005_s3 + $0x130] sm:$0xff] }
  0x2e   :  { %524 = vmatprep.subr.bf16.mxu1 %v2060_v10  ;;  %v586_v10 = vld [vmem:[%s3005_s3 + $0x138] sm:$0xff] }
  0x2f   :  { %484 = vmatpush1.bf16.msra.mxu0 %v2014_v41  ;;  %v564_v41 = vld [vmem:[%s3005_s3 + $0x88] sm:$0xff] }
  0x30   :  { %485 = vmatprep.subr.bf16.mxu0 %v2015_v42  ;;  %v565_v42 = vld [vmem:[%s3005_s3 + $0x90] sm:$0xff] }
  0x31   :  { %525 = vmatpush1.bf16.msra.mxu1 %v2062_v11  ;;  %v587_v11 = vld [vmem:[%s3005_s3 + $0x140] sm:$0xff] }
  0x32   :  { %526 = vmatprep.subr.bf16.mxu1 %v2063_v12  ;;  %v2078_v12 = vmov 0.0  }
  0x33   :  { %486 = vmatpush1.bf16.msra.mxu0 %v2017_v45  ;;  %v566_v45 = vld [vmem:[%s3005_s3 + $0x98] sm:$0xff] }
  0x34   :  { %487 = vmatprep.subr.bf16.mxu0 %v2018_v46  ;;  %v567_v46 = vld [vmem:[%s3005_s3 + $0xa0] sm:$0xff] }
  0x35   :  { %527 = vmatpush1.bf16.msra.mxu1 %v2065_v16  ;;  %v589_v16 = vld [vmem:[%s3005_s3 + $0x150] sm:$0xff] }
  0x36   :  { %528 = vmatprep.subr.bf16.mxu1 %v2066_v17  ;;  %v590_v17 = vld [vmem:[%s3005_s3 + $0x158] sm:$0xff] }
  0x37   :  { %488 = vmatpush1.bf16.msra.mxu0 %v2020_v49  ;;  %v568_v49 = vld [vmem:[%s3005_s3 + $0xa8] sm:$0xff] }
  0x38   :  { %489 = vmatprep.subr.bf16.mxu0 %v2021_v50  ;;  %v569_v50 = vld [vmem:[%s3005_s3 + $0xb0] sm:$0xff] }
  0x39   :  { %529 = vmatpush1.bf16.msra.mxu1 %v2068_v20  ;;  %v593_v20 = vld [vmem:[%s3005_s3 + $0x170] sm:$0xff] }
  0x3a   :  { %530 = vmatprep.subr.bf16.mxu1 %v2069_v21  ;;  %v594_v21 = vld [vmem:[%s3005_s3 + $0x178] sm:$0xff] }
  0x3b   :  { %490 = vmatpush1.bf16.msra.mxu0 %v2023_v53  ;;  %v570_v53 = vld [vmem:[%s3005_s3 + $0xb8] sm:$0xff] }
  0x3c   :  { %491 = vmatprep.subr.bf16.mxu0 %v2024_v54  ;;  %v571_v54 = vld [vmem:[%s3005_s3 + $0xc0] sm:$0xff] }
  0x3d   :  { %531 = vmatpush1.bf16.msra.mxu1 %v2071_v24  ;;  %v102_v24 = vsub.s32 1, %v2157_v14 }
  0x3e   :  { %532 = vmatprep.subr.bf16.mxu1 %v2072_v25  ;;  %v2638_v25 = vld [vmem:[%s3007_s2] sm:$0xf] }
  0x3f   :  { %492 = vmatpush1.bf16.msra.mxu0 %v2026_v59  ;;  %v608_v59 = vld [vmem:[%s3005_s3 + $0x1e8] sm:$0xff] }
  0x40   :  { %1885 = vmatprep.subr.bf16.mxu0 %v2293_v61 }
  0x41   :  { %533 = vmatpush1.bf16.msra.mxu1 %v2074_v28 }
  0x42   :  { %494 = vmatmul.mubr.bf16.vlgmr.msra.gmra.mrb[0].mxu0 %v2306_v1  ;;  %1969 = vmatprep.subr.bf16.mxu1 %v2293_v61 }
  0x43   :  { %1887 = vmatpush3.bf16.msra.mxu0 %v2293_v61  ;;  %1773 = vmatprep.mubr.msk.f32.mxu0 %vm681_vm0, %v547_v3  ;;  %v579_v3 = vld [vmem:[%s3005_s3 + $0x100] sm:$0xff] }
  0x44   :  { %1889 = vmatprep.subr.bf16.mxu0 %v2309_v2  ;;  %535 = vmatmul.mubr.bf16.vlgmr.msra.gmra.mrb[0].mxu1 %v2306_v1  ;;  %v577_v1 = vld [vmem:[%s3005_s3 + $0xf0] sm:$0xff] }
  0x45   :  { %1972 = vmatpush3.bf16.msra.mxu1 %v2293_v61  ;;  %1848 = vmatprep.mubr.msk.f32.mxu1 %vm681_vm0, %v597_v31 }
  0x46   :  { %1970 = vmatprep.subr.bf16.mxu1 %v2309_v2 }
  0x47   :  { %1891 = vmatpush3.bf16.msra.mxu0 %v2309_v2 }
  0x48   :  { %1893 = vmatprep.subr.bf16.mxu0 %v2330_v8 }
  0x49   :  { %1973 = vmatpush3.bf16.msra.mxu1 %v2309_v2 }
  0x4a   :  { %1971 = vmatprep.subr.bf16.mxu1 %v2330_v8 }
  0x4b   :  { %1895 = vmatpush3.bf16.msra.mxu0 %v2330_v8 }
  0x4d   :  { %1974 = vmatpush3.bf16.msra.mxu1 %v2330_v8 }
  0x4e   :  { %1774 = vmatmul.mubr.msk.f32.vlgmr.msra.gmra.mrb[4].mxu0 %vm681_vm0, %v548_v13  ;;  %1896 = vmatprep.subr.bf16.mxu1 %v2076_v40  ;;  %v1259_v13 = vld [vmem:[%s3006_s6] sm:$0x1] }
  0x4f   :  { %1776 = vmatprep.mubr.msk.f32.mxu0 %vm681_vm0, %v549_v15  ;;  %v588_v15 = vld [vmem:[%s3005_s3 + $0x148] sm:$0xff] }
  0x50   :  { %1849 = vmatmul.mubr.msk.f32.vlgmr.msra.gmra.mrb[4].mxu1 %vm681_vm0, %v598_v38 }
  0x51   :  { %1851 = vmatprep.mubr.msk.f32.mxu1 %vm681_vm0, %v599_v39  ;;  %1898 = vmatpush3.bf16.msra.mxu1 %v2293_v61  ;;  %v574_v61 = vld [vmem:[%s3005_s3 + $0xd8] sm:$0xff] }
  0x52   :  { %1777 = vmatmul.mubr.msk.f32.gmra.mrb[6].mxu0 %vm681_vm0, %v550_v18  ;;  %1899 = vmatprep.subr.bf16.mxu1 %v2076_v40  ;;  %v591_v18 = vld [vmem:[%s3005_s3 + $0x160] sm:$0xff]  ;;  %v620_v39 = vld [vmem:[%s3008_s4 + $0x18] sm:$0xff] }
  0x53   :  { %1779 = vmatprep.mubr.msk.f32.mxu0 %vm681_vm0, %v551_v19  ;;  %v592_v19 = vld [vmem:[%s3005_s3 + $0x168] sm:$0xff] }
  0x54   :  { %1852 = vmatmul.mubr.msk.f32.gmra.mrb[6].mxu1 %vm681_vm0, %v600_v43 }
  0x55   :  { %1854 = vmatprep.mubr.msk.f32.mxu1 %vm681_vm0, %v601_v44  ;;  %1901 = vmatpush3.bf16.msra.mxu1 %v2309_v2  ;;  %v578_v2 = vld [vmem:[%s3005_s3 + $0xf8] sm:$0xff] }
  0x56   :  { %1780 = vmatmul.mubr.msk.f32.gmra.mrb[8].mxu0 %vm681_vm0, %v552_v22  ;;  %1902 = vmatprep.subr.bf16.mxu1 %v2076_v40  ;;  %v595_v22 = vld [vmem:[%s3005_s3 + $0x180] sm:$0xff]  ;;  %v619_v40 = vld [vmem:[%s3008_s4 + $0x10] sm:$0xff] }
  0x57   :  { %1782 = vmatprep.mubr.msk.f32.mxu0 %vm681_vm0, %v553_v23  ;;  %v596_v23 = vld [vmem:[%s3005_s3 + $0x188] sm:$0xff] }
  0x58   :  { %1855 = vmatmul.mubr.msk.f32.gmra.mrb[8].mxu1 %vm681_vm0, %v602_v47  ;;  %v621_v47 = vld [vmem:[%s3008_s4 + $0x20] sm:$0xff] }
  0x59   :  { %1857 = vmatprep.mubr.msk.f32.mxu1 %vm681_vm0, %v603_v48  ;;  %1904 = vmatpush3.bf16.msra.mxu1 %v2330_v8  ;;  %v584_v8 = vld [vmem:[%s3005_s3 + $0x128] sm:$0xff] }
  0x5a   :  { %1783 = vmatmul.mubr.msk.f32.gmra.mrb[10].mxu0 %vm681_vm0, %v554_v26  ;;  %v103_v26 = vrot.slane %v2638_v25, %v102_v24  ;;  %v668_v24 = vld [vmem:[%s3008_s4 + $0x198] sm:$0xff] }
  0x5b   :  { %1785 = vmatprep.mubr.msk.f32.mxu0 %vm681_vm0, %v555_v27 }
  0x5c   :  { %1858 = vmatmul.mubr.msk.f32.gmra.mrb[10].mxu1 %vm681_vm0, %v604_v51 }
  0x5d   :  { %1860 = vmatprep.mubr.msk.f32.mxu1 %vm681_vm0, %v605_v52 }
  0x5e   :  { %1786 = vmatmul.mubr.msk.f32.gmra.mrb[12].mxu0 %vm681_vm0, %v556_v29 }
  0x5f   :  { %1788 = vmatprep.mubr.msk.f32.mxu0 %vm681_vm0, %v557_v30 }
  0x60   :  { %1861 = vmatmul.mubr.msk.f32.gmra.mrb[12].mxu1 %vm681_vm0, %v606_v55 }
  0x61   :  { %1863 = vmatprep.mubr.msk.f32.mxu1 %vm681_vm0, %v607_v56 }
  0x62   :  { %1789 = vmatmul.mubr.msk.f32.gmra.mrb[14].mxu0 %vm681_vm0, %v558_v32 }
  0x63   :  { %1791 = vmatprep.mubr.msk.f32.mxu0 %vm681_vm0, %v559_v33  ;;  %v618_v33 = vld [vmem:[%s3008_s4 + $0x8] sm:$0xff] }
  0x64   :  { %1864 = vmatmul.mubr.msk.f32.gmra.mrb[14].mxu1 %vm681_vm0, %v608_v59 }
  0x65   :  { %1866 = vmatprep.mubr.msk.f32.mxu1 %vm681_vm0, %v609_v60  ;;  %v626_v60 = vld [vmem:[%s3008_s4 + $0x48] sm:$0xff] }
  0x66   :  { %1792 = vmatmul.mubr.msk.f32.gmra.mrb[16].mxu0 %vm681_vm0, %v560_v34  ;;  %v617_v34 = vld [vmem:[%s3008_s4] sm:$0xff] }
  0x67   :  { %1794 = vmatprep.mubr.msk.f32.mxu0 %vm681_vm0, %v561_v35 }
  0x68   :  { %1867 = vmatmul.mubr.msk.f32.gmra.mrb[16].mxu1 %vm681_vm0, %v610_v63 }
  0x69   :  { %1881 = vmatprep.mubr.msk.f32.mxu1 %vm2077_vm1, %v2078_v12 }
  0x6a   :  { %1795 = vmatmul.mubr.msk.f32.gmra.mrb[18].mxu0 %vm681_vm0, %v562_v36 }
  0x6b   :  { %1797 = vmatprep.mubr.msk.f32.mxu0 %vm681_vm0, %v563_v37 }
  0x6c   :  { %1882 = vmatmul.mubr.msk.f32.vlgmr.msra.gmra.mrb[18].mxu1 %vm681_vm0, %v1259_v13 }
  0x6e   :  { %1798 = vmatmul.mubr.msk.f32.gmra.mrb[20].mxu0 %vm681_vm0, %v564_v41 }
  0x6f   :  { %1800 = vmatprep.mubr.msk.f32.mxu0 %vm681_vm0, %v565_v42 }
  0x72   :  { %1801 = vmatmul.mubr.msk.f32.gmra.mrb[22].mxu0 %vm681_vm0, %v566_v45 }
  0x73   :  { %1803 = vmatprep.mubr.msk.f32.mxu0 %vm681_vm0, %v567_v46  ;;  %v622_v46 = vld [vmem:[%s3008_s4 + $0x28] sm:$0xff] }
  0x76   :  { %1804 = vmatmul.mubr.msk.f32.gmra.mrb[24].mxu0 %vm681_vm0, %v568_v49 }
  0x77   :  { %1806 = vmatprep.mubr.msk.f32.mxu0 %vm681_vm0, %v569_v50 }
  0x7a   :  { %1807 = vmatmul.mubr.msk.f32.gmra.mrb[26].mxu0 %vm681_vm0, %v570_v53  ;;  %v624_v53 = vld [vmem:[%s3008_s4 + $0x38] sm:$0xff] }
  0x7b   :  { %1809 = vmatprep.mubr.msk.f32.mxu0 %vm681_vm0, %v571_v54  ;;  %v623_v54 = vld [vmem:[%s3008_s4 + $0x30] sm:$0xff] }
  0x7e   :  { %1810 = vmatmul.mubr.msk.f32.gmra.mrb[28].mxu0 %vm681_vm0, %v572_v57 }
  0x7f   :  { %1812 = vmatprep.mubr.msk.f32.mxu0 %vm681_vm0, %v573_v58 }
  0x82   :  { %1813 = vmatmul.mubr.msk.f32.gmra.mrb[30].mxu0 %vm681_vm0, %v574_v61  ;;  %v625_v61 = vld [vmem:[%s3008_s4 + $0x40] sm:$0xff] }
  0x83   :  { %1815 = vmatprep.mubr.msk.f32.mxu0 %vm681_vm0, %v575_v62 }
  0x86   :  { %1816 = vmatmul.mubr.msk.f32.gmra.mrb[32].mxu0 %vm681_vm0, %v576_v0 }
  0x87   :  { %1818 = vmatprep.mubr.msk.f32.mxu0 %vm681_vm0, %v577_v1 }
  0x8a   :  { %1819 = vmatmul.mubr.msk.f32.gmra.mrb[34].mxu0 %vm681_vm0, %v578_v2 }
  0x8b   :  { %1821 = vmatprep.mubr.msk.f32.mxu0 %vm681_vm0, %v579_v3 }
  0x8e   :  { %1822 = vmatmul.mubr.msk.f32.gmra.mrb[36].mxu0 %vm681_vm0, %v580_v4  ;;  %v628_v4 = vld [vmem:[%s3008_s4 + $0x58] sm:$0xff] }
  0x8f   :  { %1824 = vmatprep.mubr.msk.f32.mxu0 %vm681_vm0, %v581_v5 }
  0x92   :  { %1825 = vmatmul.mubr.msk.f32.gmra.mrb[38].mxu0 %vm681_vm0, %v582_v6  ;;  %v627_v6 = vld [vmem:[%s3008_s4 + $0x50] sm:$0xff] }
  0x93   :  { %1827 = vmatprep.mubr.msk.f32.mxu0 %vm681_vm0, %v583_v7 }
  0x96   :  { %1828 = vmatmul.mubr.msk.f32.gmra.mrb[40].mxu0 %vm681_vm0, %v584_v8 }
  0x97   :  { %1830 = vmatprep.mubr.msk.f32.mxu0 %vm681_vm0, %v585_v9 }
  0x9a   :  { %1831 = vmatmul.mubr.msk.f32.gmra.mrb[42].mxu0 %vm681_vm0, %v586_v10 }
  0x9b   :  { %1833 = vmatprep.mubr.msk.f32.mxu0 %vm681_vm0, %v587_v11 }
  0x9e   :  { %1834 = vmatmul.mubr.msk.f32.gmra.mrb[44].mxu0 %vm681_vm0, %v588_v15  ;;  %v630_v15 = vld [vmem:[%s3008_s4 + $0x68] sm:$0xff] }
  0x9f   :  { %1836 = vmatprep.mubr.msk.f32.mxu0 %vm681_vm0, %v589_v16  ;;  %v629_v16 = vld [vmem:[%s3008_s4 + $0x60] sm:$0xff] }
  0xa2   :  { %1837 = vmatmul.mubr.msk.f32.gmra.mrb[46].mxu0 %vm681_vm0, %v590_v17 }
  0xa3   :  { %1839 = vmatprep.mubr.msk.f32.mxu0 %vm681_vm0, %v591_v18 }
  0xa6   :  { %1840 = vmatmul.mubr.msk.f32.gmra.mrb[48].mxu0 %vm681_vm0, %v592_v19 }
  0xa7   :  { %1842 = vmatprep.mubr.msk.f32.mxu0 %vm681_vm0, %v593_v20 }
  0xaa   :  { %1843 = vmatmul.mubr.msk.f32.gmra.mrb[50].mxu0 %vm681_vm0, %v594_v21 }
  0xab   :  { %1845 = vmatprep.mubr.msk.f32.mxu0 %vm681_vm0, %v595_v22  ;;  %v632_v22 = vld [vmem:[%s3008_s4 + $0x78] sm:$0xff] }
  0xae   :  { %1846 = vmatmul.mubr.msk.f32.gmra.mrb[52].mxu0 %vm681_vm0, %v596_v23  ;;  %v631_v23 = vld [vmem:[%s3008_s4 + $0x70] sm:$0xff] }
 0x115   :  { %v2641_v27 = vpop.f32.mrb[0].mxu0 }
 0x116   :  { %v497_v28 = vpop.f32.mrb[1].mxu0 }
 0x117   :  { %v498_v29 = vadd.f32 %v497_v28, %v103_v26  ;;  %v499_v30 = vpop.f32.mrb[2].mxu0  ;;  %v2699_v2 = vpop.f32.mrb[0].mxu1 }
 0x118   :  { %v500_v31 = vpop.f32.mrb[3].mxu0  ;;  %v2706_v5 = vpop.f32.mrb[1].mxu1 }
 0x119   :  { %v544_v32 = vmax.f32 %v498_v29, 0.0  ;;  %v540_v7 = vpop.f32.mrb[2].mxu1  ;;  %v667_v29 = vld [vmem:[%s3008_s4 + $0x190] sm:$0xff] }
 0x11a   :  { %v541_v10 = vpop.f32.mrb[3].mxu1 }
 0x11b   :  { %1402 = vmatprep.mubr.f32.mxu1 %v544_v32 }
 0x121   :  { %v1775_v35 = vpop.f32.mrb[4].mxu0 }
 0x122   :  { %v2649_v36 = vadd.f32 %v1775_v35, %v618_v33  ;;  %v940_v37 = vpop.f32.mrb[5].mxu0 }
 0x123   :  { %v2651_v38 = vadd.f32 %v940_v37, %v617_v34  ;;  %v1850_v32 = vpop.f32.mrb[4].mxu1  ;;  %v634_v34 = vld [vmem:[%s3008_s4 + $0x88] sm:$0xff] }
 0x124   :  { %v2750_v35 = vadd.f32 %v1850_v32, %v668_v24  ;;  %v1190_v37 = vpop.f32.mrb[5].mxu1  ;;  %v637_v24 = vld [vmem:[%s3008_s4 + $0xa0] sm:$0xff] }
 0x125   :  { %v1907_v41 = vpack.c.bf16 %v2649_v36, %v2651_v38  ;;  %v1778_v42 = vpop.f32.mrb[6].mxu0 }
 0x126   :  { %v2661_v43 = vadd.f32 %v1778_v42, %v620_v39  ;;  %v950_v44 = vpop.f32.mrb[7].mxu0  ;;  %v633_v39 = vld [vmem:[%s3008_s4 + $0x80] sm:$0xff]  ;;  %v670_v42 = vld [vmem:[%s3008_s4 + $0x1a8] sm:$0xff] }
 0x127   :  { %v2663_v45 = vadd.f32 %v950_v44, %v619_v40  ;;  %v2755_v40 = vadd.f32 %v1190_v37, %v667_v29  ;;  %v674_v29 = vld [vmem:[%s3008_s4 + $0x1c8] sm:$0xff] }
 0x129   :  { %v1911_v48 = vpack.c.bf16 %v2661_v43, %v2663_v45  ;;  %v1781_v49 = vpop.f32.mrb[8].mxu0 }
 0x12a   :  { %v2673_v50 = vadd.f32 %v1781_v49, %v622_v46  ;;  %v960_v51 = vpop.f32.mrb[9].mxu0 }
 0x12b   :  { %v2675_v52 = vadd.f32 %v960_v51, %v621_v47  ;;  %v669_v47 = vld [vmem:[%s3008_s4 + $0x1a0] sm:$0xff] }
 0x12d   :  { %v1915_v55 = vpack.c.bf16 %v2673_v50, %v2675_v52  ;;  %v1784_v56 = vpop.f32.mrb[10].mxu0 }
 0x12e   :  { %v2685_v57 = vadd.f32 %v1784_v56, %v624_v53  ;;  %v970_v58 = vpop.f32.mrb[11].mxu0  ;;  %v1941_v53 = vpack.c.bf16 %v2750_v35, %v2755_v40 }
 0x12f   :  { %v2687_v59 = vadd.f32 %v970_v58, %v623_v54  ;;  %v1853_v54 = vpop.f32.mrb[6].mxu1  ;;  %v636_v58 = vld [vmem:[%s3008_s4 + $0x98] sm:$0xff] }
 0x131   :  { %v1919_v62 = vpack.c.bf16 %v2685_v57, %v2687_v59  ;;  %v1787_v63 = vpop.f32.mrb[12].mxu0 }
 0x132   :  { %v2697_v0 = vadd.f32 %v1787_v63, %v626_v60  ;;  %v980_v1 = vpop.f32.mrb[13].mxu0  ;;  %v2770_v60 = vadd.f32 %v1853_v54, %v670_v42  ;;  %v635_v63 = vld [vmem:[%s3008_s4 + $0x90] sm:$0xff]  ;;  %v640_v42 = vld [vmem:[%s3008_s4 + $0xb8] sm:$0xff] }
 0x133   :  { %v2701_v3 = vadd.f32 %v980_v1, %v625_v61  ;;  %v1200_v61 = vpop.f32.mrb[7].mxu1  ;;  %v676_v54 = vld [vmem:[%s3008_s4 + $0x1d8] sm:$0xff] }
 0x134   :  { %v2775_v1 = vadd.f32 %v1200_v61, %v669_v47  ;;  %v675_v61 = vld [vmem:[%s3008_s4 + $0x1d0] sm:$0xff] }
 0x135   :  { %v1923_v8 = vpack.c.bf16 %v2697_v0, %v2701_v3  ;;  %v1790_v9 = vpop.f32.mrb[14].mxu0  ;;  %v648_v0 = vld [vmem:[%s3008_s4 + $0xf8] sm:$0xff]  ;;  %v647_v3 = vld [vmem:[%s3008_s4 + $0xf0] sm:$0xff] }
 0x136   :  { %v2713_v11 = vadd.f32 %v1790_v9, %v628_v4  ;;  %v990_v12 = vpop.f32.mrb[15].mxu0  ;;  %v672_v4 = vld [vmem:[%s3008_s4 + $0x1b8] sm:$0xff]  ;;  %v671_v9 = vld [vmem:[%s3008_s4 + $0x1b0] sm:$0xff] }
 0x137   :  { %v2715_v13 = vadd.f32 %v990_v12, %v627_v6 }
 0x139   :  { %v1927_v17 = vpack.c.bf16 %v2713_v11, %v2715_v13  ;;  %v1793_v18 = vpop.f32.mrb[16].mxu0  ;;  %v650_v11 = vld [vmem:[%s3008_s4 + $0x108] sm:$0xff]  ;;  %v649_v13 = vld [vmem:[%s3008_s4 + $0x100] sm:$0xff] }
 0x13a   :  { %v2725_v19 = vadd.f32 %v1793_v18, %v630_v15  ;;  %v1000_v20 = vpop.f32.mrb[17].mxu0  ;;  %v1945_v15 = vpack.c.bf16 %v2770_v60, %v2775_v1  ;;  %v1260_v60 = vld [vmem:[%s3009_s7] sm:$0x1] }
 0x13b   :  { %v2727_v21 = vadd.f32 %v1000_v20, %v629_v16  ;;  %v1856_v16 = vpop.f32.mrb[8].mxu1  ;;  %v638_v20 = vld [vmem:[%s3008_s4 + $0xa8] sm:$0xff] }
 0x13d   :  { %v1931_v26 = vpack.c.bf16 %v2725_v19, %v2727_v21  ;;  %v1796_v28 = vpop.f32.mrb[18].mxu0  ;;  %v652_v19 = vld [vmem:[%s3008_s4 + $0x118] sm:$0xff] }
 0x13e   :  { %v2743_v30 = vadd.f32 %v1796_v28, %v632_v22  ;;  %v1010_v31 = vpop.f32.mrb[19].mxu0  ;;  %v2788_v22 = vadd.f32 %v1856_v16, %v672_v4  ;;  %v678_v16 = vld [vmem:[%s3008_s4 + $0x1e8] sm:$0xff] }
 0x13f   :  { %v2745_v33 = vadd.f32 %v1010_v31, %v631_v23  ;;  %v1210_v23 = vpop.f32.mrb[9].mxu1 }
 0x140   :  { %v2796_v28 = vadd.f32 %v1210_v23, %v671_v9  ;;  %v1859_v38 = vpop.f32.mrb[10].mxu1  ;;  %v677_v23 = vld [vmem:[%s3008_s4 + $0x1e0] sm:$0xff] }
 0x141   :  { %v1935_v44 = vpack.c.bf16 %v2743_v30, %v2745_v33  ;;  %v1799_v46 = vpop.f32.mrb[20].mxu0  ;;  %v1220_v47 = vpop.f32.mrb[11].mxu1  ;;  %v653_v30 = vld [vmem:[%s3008_s4 + $0x120] sm:$0xff] }
 0x142   :  { %v1026_v49 = vadd.f32 %v1799_v46, %v634_v34  ;;  %v1020_v51 = vpop.f32.mrb[21].mxu0  ;;  %v673_v34 = vld [vmem:[%s3008_s4 + $0x1c0] sm:$0xff]  ;;  %v1949_v36 = vpack.c.bf16 %v2788_v22, %v2796_v28  ;;  %v2809_v46 = vadd.f32 %v1859_v38, %v674_v29  ;;  %v1862_v45 = vpop.f32.mrb[12].mxu1  ;;  %v680_v38 = vld [vmem:[%s3008_s4 + $0x1f8] sm:$0xff] }
 0x143   :  { %v1021_v56 = vadd.f32 %v1020_v51, %v633_v39  ;;  %v2817_v51 = vadd.f32 %v1220_v47, %v673_v34  ;;  %v1230_v9 = vpop.f32.mrb[13].mxu1  ;;  %v679_v47 = vld [vmem:[%s3008_s4 + $0x1f0] sm:$0xff] }
 0x144   :  { %v1865_v52 = vpop.f32.mrb[14].mxu1 }
 0x145   :  { %v1905_v6 = vpack.c.bf16 %v1026_v49, %v1021_v56  ;;  %v1802_v7 = vpop.f32.mrb[22].mxu0  ;;  %v639_v49 = vld [vmem:[%s3008_s4 + $0xb0] sm:$0xff]  ;;  %v1953_v43 = vpack.c.bf16 %v2809_v46, %v2817_v51  ;;  %v1240_v34 = vpop.f32.mrb[15].mxu1 }
 0x146   :  { %v1036_v10 = vadd.f32 %v1802_v7, %v636_v58  ;;  %v1030_v12 = vpop.f32.mrb[23].mxu0  ;;  %v2830_v7 = vadd.f32 %v1862_v45, %v676_v54  ;;  %v1868_v59 = vpop.f32.mrb[16].mxu1 }
 0x147   :  { %v1031_v18 = vadd.f32 %v1030_v12, %v635_v63  ;;  %1906 = vmatprep.subr.bf16.mxu1 %v1905_v6  ;;  %v642_v6 = vld [vmem:[%s3008_s4 + $0xc8] sm:$0xff]  ;;  %v2838_v12 = vadd.f32 %v1230_v9, %v675_v61  ;;  %v1250_v61 = vpop.f32.mrb[17].mxu1 }
 0x148   :  { %1908 = vmatpush3.bf16.msra.mxu1 %v1907_v41  ;;  %v2881_v45 = vadd.f32 %v1250_v61, %v679_v47 }
 0x149   :  { %v1909_v31 = vpack.c.bf16 %v1036_v10, %v1031_v18  ;;  %v1805_v32 = vpop.f32.mrb[24].mxu0  ;;  %v641_v10 = vld [vmem:[%s3008_s4 + $0xc0] sm:$0xff]  ;;  %v1957_v50 = vpack.c.bf16 %v2830_v7, %v2838_v12 }
 0x14a   :  { %v1046_v37 = vadd.f32 %v1805_v32, %v638_v20  ;;  %v1040_v39 = vpop.f32.mrb[25].mxu0  ;;  %v2851_v32 = vadd.f32 %v1865_v52, %v678_v16 }
 0x14b   :  { %v1041_v41 = vadd.f32 %v1040_v39, %v637_v24  ;;  %1910 = vmatprep.subr.bf16.mxu1 %v1909_v31  ;;  %v644_v31 = vld [vmem:[%s3008_s4 + $0xd8] sm:$0xff]  ;;  %v2859_v39 = vadd.f32 %v1240_v34, %v677_v23 }
 0x14c   :  { %1912 = vmatpush3.bf16.msra.mxu1 %v1911_v48 }
 0x14d   :  { %v1913_v56 = vpack.c.bf16 %v1046_v37, %v1041_v41  ;;  %v1808_v58 = vpop.f32.mrb[26].mxu0  ;;  %v643_v37 = vld [vmem:[%s3008_s4 + $0xd0] sm:$0xff]  ;;  %v1961_v57 = vpack.c.bf16 %v2851_v32, %v2859_v39 }
 0x14e   :  { %v1056_v63 = vadd.f32 %v1808_v58, %v640_v42  ;;  %v1050_v4 = vpop.f32.mrb[27].mxu0  ;;  %v2872_v58 = vadd.f32 %v1868_v59, %v680_v38 }
 0x14f   :  { %v1051_v48 = vadd.f32 %v1050_v4, %v639_v49  ;;  %1914 = vmatprep.subr.bf16.mxu1 %v1913_v56  ;;  %v646_v56 = vld [vmem:[%s3008_s4 + $0xe8] sm:$0xff]  ;;  %v110_v4 = vsub.s32 3, %v2157_v14 }
 0x150   :  { %1916 = vmatpush3.bf16.msra.mxu1 %v1915_v55 }
 0x151   :  { %v1917_v18 = vpack.c.bf16 %v1056_v63, %v1051_v48  ;;  %v1811_v20 = vpop.f32.mrb[28].mxu0  ;;  %v645_v63 = vld [vmem:[%s3008_s4 + $0xe0] sm:$0xff]  ;;  %v98_v48 = vsub.s32 0, %v2157_v14 }
 0x152   :  { %v1066_v24 = vadd.f32 %v1811_v20, %v642_v6  ;;  %v1060_v29 = vpop.f32.mrb[29].mxu0 }
 0x153   :  { %v1061_v55 = vadd.f32 %v1060_v29, %v641_v10  ;;  %1918 = vmatprep.subr.bf16.mxu1 %v1917_v18  ;;  %v1965_v18 = vpack.c.bf16 %v2872_v58, %v2881_v45  ;;  %v99_v23 = vrot.slane %v2638_v25, %v98_v48 }
 0x154   :  { %1920 = vmatpush3.bf16.msra.mxu1 %v1919_v62 }
 0x155   :  { %v1921_v41 = vpack.c.bf16 %v1066_v24, %v1061_v55  ;;  %v1814_v42 = vpop.f32.mrb[30].mxu0  ;;  %v496_v34 = vadd.f32 %v2641_v27, %v99_v23  ;;  %v651_v27 = vld [vmem:[%s3008_s4 + $0x110] sm:$0xff] }
 0x156   :  { %v1076_v49 = vadd.f32 %v1814_v42, %v644_v31  ;;  %v1070_v54 = vpop.f32.mrb[31].mxu0 }
 0x157   :  { %v1071_v62 = vadd.f32 %v1070_v54, %v643_v37  ;;  %1922 = vmatprep.subr.bf16.mxu1 %v1921_v41  ;;  %v543_v21 = vmax.f32 %v496_v34, 0.0  ;;  %v659_v34 = vld [vmem:[%s3008_s4 + $0x150] sm:$0xff] }
 0x158   :  { %1924 = vmatpush3.bf16.msra.mxu1 %v1923_v8  ;;  %v111_v8 = vrot.slane %v2638_v25, %v110_v4 }
 0x159   :  { %v1925_v6 = vpack.c.bf16 %v1076_v49, %v1071_v62  ;;  %v1817_v9 = vpop.f32.mrb[32].mxu0 }
 0x15a   :  { %v1086_v10 = vadd.f32 %v1817_v9, %v646_v56  ;;  %v1080_v16 = vpop.f32.mrb[33].mxu0  ;;  %v654_v56 = vld [vmem:[%s3008_s4 + $0x128] sm:$0xff]  ;;  %v655_v9 = vld [vmem:[%s3008_s4 + $0x130] sm:$0xff] }
 0x15b   :  { %v1081_v20 = vadd.f32 %v1080_v16, %v645_v63  ;;  %1926 = vmatprep.subr.bf16.mxu1 %v1925_v6  ;;  %v656_v6 = vld [vmem:[%s3008_s4 + $0x138] sm:$0xff] }
 0x15c   :  { %1928 = vmatpush3.bf16.msra.mxu1 %v1927_v17  ;;  %v539_v17 = vadd.f32 %v2706_v5, %v111_v8 }
 0x15d   :  { %v1929_v24 = vpack.c.bf16 %v1086_v10, %v1081_v20  ;;  %v1820_v29 = vpop.f32.mrb[34].mxu0  ;;  %v2937_v20 = vpop.f32.mrb[18].mxu1 }
 0x15e   :  { %v1096_v52 = vadd.f32 %v1820_v29, %v648_v0  ;;  %v1090_v55 = vpop.f32.mrb[35].mxu0  ;;  %v546_v5 = vmax.f32 %v539_v17, 0.0  ;;  %v1883_v8 = vpop.f32.mrb[19].mxu1  ;;  %v657_v29 = vld [vmem:[%s3008_s4 + $0x140] sm:$0xff]  ;;  %v660_v17 = vld [vmem:[%s3008_s4 + $0x158] sm:$0xff] }
 0x15f   :  { %v1091_v31 = vadd.f32 %v1090_v55, %v647_v3  ;;  %1930 = vmatprep.subr.bf16.mxu1 %v1929_v24  ;;  %v658_v24 = vld [vmem:[%s3008_s4 + $0x148] sm:$0xff] }
 0x160   :  { %1932 = vmatpush3.bf16.msra.mxu1 %v1931_v26 }
 0x161   :  { %v1933_v37 = vpack.c.bf16 %v1096_v52, %v1091_v31  ;;  %v1823_v38 = vpop.f32.mrb[36].mxu0 }
 0x162   :  { %v2910_v41 = vadd.f32 %v1823_v38, %v650_v11  ;;  %v1100_v42 = vpop.f32.mrb[37].mxu0 }
 0x163   :  { %v2912_v47 = vadd.f32 %v1100_v42, %v649_v13  ;;  %1934 = vmatprep.subr.bf16.mxu1 %v1933_v37 }
 0x164   :  { %1936 = vmatpush3.bf16.msra.mxu1 %v1935_v44 }
 0x165   :  { %v1939_v26 = vpack.c.bf16 %v2910_v41, %v2912_v47  ;;  %v1826_v49 = vpop.f32.mrb[38].mxu0 }
 0x166   :  { %v1116_v54 = vadd.f32 %v1826_v49, %v652_v19  ;;  %v1110_v59 = vpop.f32.mrb[39].mxu0  ;;  %v662_v19 = vld [vmem:[%s3008_s4 + $0x168] sm:$0xff] }
 0x167   :  { %v1111_v62 = vadd.f32 %v1110_v59, %v651_v27  ;;  %1403 = vmatmul.mubr.f32.vlgmr.msra.gmra.mrb[20].mxu1 %v543_v21  ;;  %v661_v27 = vld [vmem:[%s3008_s4 + $0x160] sm:$0xff] }
 0x168   :  { %1472 = vmatprep.mubr.f32.mxu1 %v546_v5 }
 0x169   :  { %v1943_v33 = vpack.c.bf16 %v1116_v54, %v1111_v62  ;;  %v1829_v44 = vpop.f32.mrb[40].mxu0  ;;  %v664_v62 = vld [vmem:[%s3008_s4 + $0x178] sm:$0xff] }
 0x16a   :  { %v1126_v61 = vadd.f32 %v1829_v44, %v654_v56  ;;  %v1120_v63 = vpop.f32.mrb[41].mxu0  ;;  %v663_v56 = vld [vmem:[%s3008_s4 + $0x170] sm:$0xff] }
 0x16b   :  { %v1121_v4 = vadd.f32 %v1120_v63, %v653_v30 }
 0x16d   :  { %v1947_v10 = vpack.c.bf16 %v1126_v61, %v1121_v4  ;;  %v1832_v16 = vpop.f32.mrb[42].mxu0 }
 0x16e   :  { %v1136_v0 = vadd.f32 %v1832_v16, %v656_v6  ;;  %v1130_v3 = vpop.f32.mrb[43].mxu0  ;;  %v666_v6 = vld [vmem:[%s3008_s4 + $0x188] sm:$0xff] }
 0x16f   :  { %v1131_v23 = vadd.f32 %v1130_v3, %v655_v9  ;;  %v665_v9 = vld [vmem:[%s3008_s4 + $0x180] sm:$0xff] }
 0x171   :  { %v1951_v52 = vpack.c.bf16 %v1136_v0, %v1131_v23  ;;  %v1835_v55 = vpop.f32.mrb[44].mxu0 }
 0x172   :  { %v1146_v31 = vadd.f32 %v1835_v55, %v658_v24  ;;  %v1140_v11 = vpop.f32.mrb[45].mxu0 }
 0x173   :  { %v1141_v13 = vadd.f32 %v1140_v11, %v657_v29 }
 0x175   :  { %v1955_v37 = vpack.c.bf16 %v1146_v31, %v1141_v13  ;;  %v1838_v38 = vpop.f32.mrb[46].mxu0 }
 0x176   :  { %v1156_v41 = vadd.f32 %v1838_v38, %v660_v17  ;;  %v1150_v42 = vpop.f32.mrb[47].mxu0 }
 0x177   :  { %v1151_v47 = vadd.f32 %v1150_v42, %v659_v34 }
 0x179   :  { %v1959_v5 = vpack.c.bf16 %v1156_v41, %v1151_v47  ;;  %v1841_v21 = vpop.f32.mrb[48].mxu0 }
 0x17a   :  { %v1166_v49 = vadd.f32 %v1841_v21, %v662_v19  ;;  %v1160_v54 = vpop.f32.mrb[49].mxu0 }
 0x17b   :  { %v1161_v59 = vadd.f32 %v1160_v54, %v661_v27 }
 0x17d   :  { %v1963_v30 = vpack.c.bf16 %v1166_v49, %v1161_v59  ;;  %v1844_v44 = vpop.f32.mrb[50].mxu0 }
 0x17e   :  { %v1176_v61 = vadd.f32 %v1844_v44, %v664_v62  ;;  %v1170_v63 = vpop.f32.mrb[51].mxu0 }
 0x17f   :  { %v1171_v4 = vadd.f32 %v1170_v63, %v663_v56 }
 0x181   :  { %v1967_v16 = vpack.c.bf16 %v1176_v61, %v1171_v4  ;;  %v1847_v0 = vpop.f32.mrb[52].mxu0 }
 0x182   :  { %v1186_v3 = vadd.f32 %v1847_v0, %v666_v6  ;;  %v1180_v8 = vpop.f32.mrb[53].mxu0 }
 0x183   :  { %v1181_v23 = vadd.f32 %v1180_v8, %v665_v9 }
 0x185   :  { %v1937_v24 = vpack.c.bf16 %v1186_v3, %v1181_v23 }
 0x187   :  { %1938 = vmatprep.subr.bf16.mxu1 %v1937_v24 }
 0x188   :  { %1940 = vmatpush3.bf16.msra.mxu1 %v1939_v26  ;;  %v106_v26 = vsub.s32 2, %v2157_v14 }
 0x189   :  { %1942 = vmatprep.subr.bf16.mxu1 %v1941_v53 }
 0x18a   :  { %v107_v35 = vrot.slane %v2638_v25, %v106_v26  ;;  %v1331_v25 = vadd.f32 %v2937_v20, %v1260_v60 }
 0x18c   :  { %1944 = vmatpush3.bf16.msra.mxu1 %v1943_v33  ;;  %v537_v40 = vadd.f32 %v2699_v2, %v107_v35  ;;  %v1337_v1 = vrot.slane %v1331_v25, %v98_v48 }
 0x18d   :  { %1946 = vmatprep.subr.bf16.mxu1 %v1945_v15 }
 0x18e   :  { %v545_v53 = vmax.f32 %v537_v40, 0.0 }
 0x190   :  { %1948 = vmatpush3.bf16.msra.mxu1 %v1947_v10 }
 0x191   :  { %1950 = vmatprep.subr.bf16.mxu1 %v1949_v36 }
 0x194   :  { %1952 = vmatpush3.bf16.msra.mxu1 %v1951_v52 }
 0x195   :  { %1954 = vmatprep.subr.bf16.mxu1 %v1953_v43 }
 0x198   :  { %1956 = vmatpush3.bf16.msra.mxu1 %v1955_v37 }
 0x199   :  { %1958 = vmatprep.subr.bf16.mxu1 %v1957_v50 }
 0x19c   :  { %1960 = vmatpush3.bf16.msra.mxu1 %v1959_v5 }
 0x19d   :  { %1962 = vmatprep.subr.bf16.mxu1 %v1961_v57 }
 0x1a0   :  { %1964 = vmatpush3.bf16.msra.mxu1 %v1963_v30 }
 0x1a1   :  { %1966 = vmatprep.subr.bf16.mxu1 %v1965_v18 }
 0x1a4   :  { %1968 = vmatpush3.bf16.msra.mxu1 %v1967_v16 }
 0x1a7   :  { %1473 = vmatmul.mubr.f32.vlgmr.msra.gmra.mrb[22].mxu1 %v545_v53 }
 0x23a   :  { %v1723_v15 = vpop.f32.mrb[20].mxu1 }
 0x23b   :  { %v1724_v22 = vpop.f32.mrb[21].mxu1 }
 0x23c   :  { %v1725_v28 = vadd.f32 %v1724_v22, %v1723_v15 }
 0x23e   :  { %v1405_v2 = vadd.f32 %v1725_v28, %v1337_v1 }
 0x27a   :  { %v1758_v36 = vpop.f32.mrb[22].mxu1 }
 0x27b   :  { %v1759_v46 = vpop.f32.mrb[23].mxu1 }
 0x27c   :  { %v1760_v51 = vadd.f32 %v1759_v46, %v1758_v36 }
 0x27e   :  { %v1475_v43 = vadd.f32 %v1760_v51, %v1405_v2 }
 0x280   :  { %1479 = vst.msk [vmem:[%s3010_s8] sm:$0x3] %vm1478_vm2, %v1475_v43 }

</bundles_post_ra>
